<compile_context>
chip_gen: v6e
topology: v6e:2x2x1
jax: 0.10.0
libtpu: 0.0.40
codegen_flags: <defaults>
</compile_context>

<pallas_src>
import math
import functools

import jax
import jax.numpy as jnp
from jax.experimental import pallas as pl
from jax.experimental.pallas import tpu as pltpu


# ----------------------------------------------------------------------------- kernel


def _decoder_layer_kernel(
    tgt_ref, kh_ref, vh_ref,
    wq_ref, bq_ref, wo_ref, bo_ref,
    g1_ref, be1_ref, g2_ref, be2_ref, g3_ref, be3_ref,
    w1_ref, b1_ref, w2_ref, b2_ref,
    out_ref, *ws_refs,
    nhead: int, head_dim: int, softmax_in_bf16: bool,
):
    eps = 1e-5
    H, hd = nhead, head_dim
    mm = wq_ref.dtype  # MXU dtype (bf16 by default, f32 if disabled)

    def layer_norm(x, gamma, beta):
        # two-pass variance (x - mu) for numerical robustness; all stats in f32
        mu = jnp.mean(x, axis=-1, keepdims=True)
        d = x - mu
        var = jnp.mean(d * d, axis=-1, keepdims=True)
        return d * jax.lax.rsqrt(var + eps) * gamma + beta

    tgt = tgt_ref[...].astype(jnp.float32)          # (TL, E)
    TL = tgt.shape[0]

    # ---- norm1 (applied directly to tgt, as in the reference forward_post) ----
    x = layer_norm(tgt, g1_ref[...], be1_ref[...])  # (TL, E) f32

    # ---- Q projection (1/sqrt(hd) pre-folded into wq/bq in the wrapper) ----
    q = jnp.dot(x.astype(mm), wq_ref[...],
                preferred_element_type=jnp.float32) + bq_ref[...]       # (TL, E)
    # Head split of q only (K/V head shaping was hoisted to the wrapper).  Lane relayout
    # is unavoidable for head_dim < 128; kept in the known-good reshape+transpose form.
    qh = q.astype(mm).reshape(TL, H, hd).transpose(1, 0, 2)             # (H, TL, hd)

    kh = kh_ref[...]                                 # (H, S, hd) mm, projected in wrapper
    vh = vh_ref[...]                                 # (H, S, hd) mm

    # ---- heads-batched cross attention ----
    scores = jnp.einsum('hld,hsd->hls', qh, kh,
                        preferred_element_type=jnp.float32)             # (H, TL, S) f32
    scores = scores - jnp.max(scores, axis=-1, keepdims=True)
    if softmax_in_bf16:
        # bf16 EUP exp (v6e/v7x): ~2x exp throughput, scores <= 0 so error is tiny
        p = jnp.exp(scores.astype(jnp.bfloat16)).astype(jnp.float32)
    else:
        p = jnp.exp(scores)
    denom = jnp.sum(p, axis=-1, keepdims=True)
    pn = p * (1.0 / denom)            # exact divide on small (H, TL, 1) -> rows sum to 1

    if ws_refs:
        # head-averaged attention weights (average_attn_weights=True)
        ws_refs[0][...] = jnp.mean(pn, axis=0).astype(ws_refs[0].dtype)  # (TL, S)

    # bf16 operand for the PV matmul (halves the matmul operand bytes)
    ctx = jnp.einsum('hls,hsd->hld', pn.astype(mm), vh,
                     preferred_element_type=jnp.float32)                 # (H, TL, hd)

    # Out-projection consuming ctx in (H, TL, hd) order: per-head batched matmul with the
    # wrapper-pre-shaped wo (H, hd, E), then a head-sum — no explicit ctx transpose.
    attn = jnp.einsum('hld,hde->hle', ctx.astype(mm), wo_ref[...],
                      preferred_element_type=jnp.float32).sum(axis=0) + bo_ref[...]

    # ---- residual + norm2 ----
    x = layer_norm(x + attn, g2_ref[...], be2_ref[...])

    # ---- feed-forward (ReLU) ----
    h1 = jnp.dot(x.astype(mm), w1_ref[...],
                 preferred_element_type=jnp.float32) + b1_ref[...]
    h1 = jnp.maximum(h1, 0.0)
    ff = jnp.dot(h1.astype(mm), w2_ref[...],
                 preferred_element_type=jnp.float32) + b2_ref[...]

    # ---- residual + norm3 ----
    x = layer_norm(x + ff, g3_ref[...], be3_ref[...])
    out_ref[...] = x.astype(out_ref.dtype)


# ----------------------------------------------------------------------------- wrapper


def _choose_l_tile(L: int, max_tile: int):
    """Pick the L tile; pad L up to a tile multiple instead of a full-L fallback block."""
    if L <= max_tile:
        return L, L
    cands = [t for t in (512, 256, 128) if t <= max_tile] or [max_tile]
    for t in cands:
        if L % t == 0:
            return t, L
    base = cands[-1]
    l_pad = ((L + base - 1) // base) * base
    for t in cands:
        if l_pad % t == 0:
            return t, l_pad
    return base, l_pad


def transformer_decoder_layer(
    tgt, memory, params, *, nhead,
    use_bf16_matmul=True,
    return_ws=True,
    ws_dtype=jnp.float32,       # pass jnp.bfloat16 to halve the (N, L, S) writeback
    softmax_in_bf16=False,      # enable on v6e/v7x if the attention phase is EUP-bound
    max_l_tile=256,             # 512 is fine on v5e/v6e with ample VMEM; keep <=256 on v7x
    vmem_limit_bytes=None,
):
    """tgt: (L, N, E), memory: (S, N, E) — PyTorch MHA layout (seq, batch, embed)."""
    L, N, E = tgt.shape
    S = memory.shape[0]
    H = nhead
    hd = E // H

    (wq, bq, wk, bk, wv, bv, wo, bo,
     g1, be1, g2, be2, g3, be3,
     w1, bb1, w2, bb2) = params
    F = w1.shape[0]

    mm = jnp.bfloat16 if use_bf16_matmul else jnp.float32
    scale = 1.0 / math.sqrt(hd)

    tgt_b = jnp.transpose(tgt, (1, 0, 2))      # (N, L, E)
    mem_b = jnp.transpose(memory, (1, 0, 2))   # (N, S, E)

    # ---- one-time wrapper-side prep (plain XLA; runs once, NOT once per L-tile) ----
    # K/V projection hoisted out of the kernel and delivered head-shaped in the MXU dtype.
    wk_h = wk.T.reshape(E, H, hd).astype(mm)
    wv_h = wv.T.reshape(E, H, hd).astype(mm)
    kh = (jnp.einsum('nse,ehd->nhsd', mem_b.astype(mm), wk_h,
                     preferred_element_type=jnp.float32)
          + bk.reshape(1, H, 1, hd)).astype(mm)                          # (N, H, S, hd)
    vh = (jnp.einsum('nse,ehd->nhsd', mem_b.astype(mm), wv_h,
                     preferred_element_type=jnp.float32)
          + bv.reshape(1, H, 1, hd)).astype(mm)                          # (N, H, S, hd)

    # Q / out-proj / FFN weights: pre-transposed; attention scale folded into wq/bq.
    wq_t = (wq.T * scale).astype(mm)                                     # (E, E)
    bq_s = (bq * scale).astype(jnp.float32)                              # (1, E)
    wo_h = wo.T.reshape(H, hd, E).astype(mm)                             # (H, hd, E)
    w1_t = w1.T.astype(mm)                                               # (E, F)
    w2_t = w2.T.astype(mm)                                               # (F, E)

    weight_args = (wq_t, bq_s, wo_h, bo,
                   g1, be1, g2, be2, g3, be3,
                   w1_t, bb1, w2_t, bb2)

    # ---- L tiling (pad instead of full-L fallback) ----
    TL, L_pad = _choose_l_tile(L, max_l_tile)
    if L_pad != L:
        tgt_b = jnp.pad(tgt_b, ((0, 0), (0, L_pad - L), (0, 0)))
    grid = (N, L_pad // TL)

    # ---- specs ----
    data_specs = [
        pl.BlockSpec((None, TL, E), lambda n, l: (n, l, 0)),             # tgt tile
        pl.BlockSpec((None, H, S, hd), lambda n, l: (n, 0, 0, 0)),       # K heads (per batch)
        pl.BlockSpec((None, H, S, hd), lambda n, l: (n, 0, 0, 0)),       # V heads (per batch)
    ]

    def _const_index_map(ndim):
        return lambda n, l, _nd=ndim: (0,) * _nd

    # Weights never change across the grid -> single-buffered (halves their VMEM footprint).
    weight_specs = [
        pl.BlockSpec(w.shape, _const_index_map(w.ndim), pipeline_mode=pl.Buffered(1))
        for w in weight_args
    ]

    out_shapes = [jax.ShapeDtypeStruct((N, L_pad, E), tgt.dtype)]
    out_specs = [pl.BlockSpec((None, TL, E), lambda n, l: (n, l, 0))]
    if return_ws:
        out_shapes.append(jax.ShapeDtypeStruct((N, L_pad, S), ws_dtype))
        out_specs.append(pl.BlockSpec((None, TL, S), lambda n, l: (n, l, 0)))

    # ---- VMEM budget derived from actual tile sizes (overridable; cap 100 MiB) ----
    if vmem_limit_bytes is None:
        def nbytes(shape, dt):
            sz = 1
            for d in shape:
                sz *= d
            return sz * jnp.dtype(dt).itemsize

        est = 0
        est += 2 * nbytes((TL, E), jnp.float32)                 # tgt tile (double-buffered)
        est += 2 * 2 * nbytes((H, S, hd), mm)                   # K + V heads (double-buffered)
        est += sum(nbytes(w.shape, w.dtype) for w in weight_args)   # single-buffered weights
        est += 2 * nbytes((TL, E), tgt.dtype)                   # out tile
        if return_ws:
            est += 2 * nbytes((TL, S), ws_dtype)
        # in-kernel intermediates: scores/p/pn, qh/ctx, per-head out-proj, FFN hidden, x copies
        est += (3 * H * TL * S + 2 * H * TL * hd + H * TL * E + TL * F + 4 * TL * E) * 4
        vmem_limit_bytes = int(min(100 * 2 ** 20, max(32 * 2 ** 20, int(est * 1.25))))

    kernel = functools.partial(_decoder_layer_kernel, nhead=H, head_dim=hd,
                               softmax_in_bf16=softmax_in_bf16)

    results = pl.pallas_call(
        kernel,
        grid=grid,
        in_specs=data_specs + weight_specs,
        out_specs=out_specs,
        out_shape=out_shapes,
        compiler_params=pltpu.CompilerParams(
            dimension_semantics=("parallel", "parallel"),
            vmem_limit_bytes=vmem_limit_bytes,
        ),
    )(tgt_b, kh, vh, *weight_args)

    out = results[0]
    if L_pad != L:
        out = out[:, :L, :]
    out = jnp.transpose(out, (1, 0, 2))        # (L, N, E)
    if return_ws:
        ws = results[1]
        if L_pad != L:
            ws = ws[:, :L, :]
        return out, ws                          # (L, N, E), (N, L, S)
    return out


# ----------------------------------------------------------------------------- reference & params


def _reference(tgt, memory, params, nhead):
    """Pure-JAX f32 reference of the same forward_post math (for a sanity check)."""
    (wq, bq, wk, bk, wv, bv, wo, bo,
     g1, be1, g2, be2, g3, be3,
     w1, bb1, w2, bb2) = params
    L, N, E = tgt.shape
    S = memory.shape[0]
    H = nhead
    hd = E // H
    eps = 1e-5

    def ln(x, g, b):
        mu = jnp.mean(x, -1, keepdims=True)
        var = jnp.mean((x - mu) ** 2, -1, keepdims=True)
        return (x - mu) / jnp.sqrt(var + eps) * g + b

    t = jnp.transpose(tgt, (1, 0, 2))
    m = jnp.transpose(memory, (1, 0, 2))
    x = ln(t, g1, be1)
    q = (x @ wq.T + bq) / jnp.sqrt(1.0 * hd)
    k = m @ wk.T + bk
    v = m @ wv.T + bv
    qh = q.reshape(N, L, H, hd).transpose(0, 2, 1, 3)
    kh = k.reshape(N, S, H, hd).transpose(0, 2, 1, 3)
    vh = v.reshape(N, S, H, hd).transpose(0, 2, 1, 3)
    s = jnp.einsum('nhld,nhsd->nhls', qh, kh)
    p = jax.nn.softmax(s, axis=-1)
    ws = jnp.mean(p, axis=1)
    ctx = jnp.einsum('nhls,nhsd->nhld', p, vh).transpose(0, 2, 1, 3).reshape(N, L, E)
    a = ctx @ wo.T + bo
    x = ln(x + a, g2, be2)
    h = jnp.maximum(x @ w1.T + bb1, 0.0)
    f = h @ w2.T + bb2
    x = ln(x + f, g3, be3)
    return jnp.transpose(x, (1, 0, 2)), ws


def init_params(key, d_model, nhead, dim_feedforward):
    """Deterministic synthetic parameters matching nn.MultiheadAttention / Linear / LayerNorm shapes."""
    keys = jax.random.split(key, 8)
    E, F = d_model, dim_feedforward
    s = 0.1
    wq = jax.random.normal(keys[0], (E, E), jnp.float32) * s
    wk = jax.random.normal(keys[1], (E, E), jnp.float32) * s
    wv = jax.random.normal(keys[2], (E, E), jnp.float32) * s
    bq = jax.random.normal(keys[3], (1, E), jnp.float32) * s
    bk = jnp.zeros((1, E), jnp.float32)
    bv = jax.random.normal(keys[4], (1, E), jnp.float32) * s
    wo = jax.random.normal(keys[5], (E, E), jnp.float32) * s
    bo = jnp.zeros((1, E), jnp.float32)
    g1 = jnp.ones((1, E), jnp.float32); be1 = jnp.zeros((1, E), jnp.float32)
    g2 = jnp.ones((1, E), jnp.float32); be2 = jnp.zeros((1, E), jnp.float32)
    g3 = jnp.ones((1, E), jnp.float32); be3 = jnp.zeros((1, E), jnp.float32)
    w1 = jax.random.normal(keys[6], (F, E), jnp.float32) * s
    bb1 = jnp.zeros((1, F), jnp.float32)
    w2 = jax.random.normal(keys[7], (E, F), jnp.float32) * s
    bb2 = jnp.zeros((1, E), jnp.float32)
    return (wq, bq, wk, bk, wv, bv, wo, bo,
            g1, be1, g2, be2, g3, be3,
            w1, bb1, w2, bb2)


if __name__ == "__main__":
    # Small shapes consistent with the module: seq=8, batch=2, d_model=32, nhead=4, ff=64.
    L, S, N, E, H, F = 8, 8, 2, 32, 4, 64

    key = jax.random.PRNGKey(0)
    k_tgt, k_mem, k_par = jax.random.split(key, 3)
    tgt = jax.random.normal(k_tgt, (L, N, E), jnp.float32)      # (seq_tgt, batch, d_model)
    memory = jax.random.normal(k_mem, (S, N, E), jnp.float32)   # (seq_mem, batch, d_model)
    params = init_params(k_par, E, H, F)

    # TODO(synk): dropout layers are treated as identity (eval mode); no mask / pos inputs.
    out, ws = transformer_decoder_layer(tgt, memory, params, nhead=H)
    jax.block_until_ready((out, ws))
    assert out.shape == (L, N, E) and ws.shape == (N, L, S)

    # loose tolerance sanity check vs. f32 reference (kernel matmuls run in bf16)
    out_ref, ws_ref = _reference(tgt, memory, params, H)
    d_out = float(jnp.max(jnp.abs(out - out_ref)))
    d_ws = float(jnp.max(jnp.abs(ws.astype(jnp.float32) - ws_ref)))
    assert d_out < 1e-1 and d_ws < 2e-2, (d_out, d_ws)

    print("KERNEL_OK")
</pallas_src>

<mosaic_0001>
module attributes {stable_mosaic.version = 11 : i64} {
  func.func @_decoder_layer_kernel(%arg0: i32, %arg1: i32, %arg2: memref<1x8x32xf32, #tpu.memory_space<vmem>>, %arg3: memref<1x4x8x8xbf16, #tpu.memory_space<vmem>>, %arg4: memref<1x4x8x8xbf16, #tpu.memory_space<vmem>>, %arg5: memref<32x32xbf16, #tpu.memory_space<vmem>>, %arg6: memref<1x32xf32, #tpu.memory_space<vmem>>, %arg7: memref<4x8x32xbf16, #tpu.memory_space<vmem>>, %arg8: memref<1x32xf32, #tpu.memory_space<vmem>>, %arg9: memref<1x32xf32, #tpu.memory_space<vmem>>, %arg10: memref<1x32xf32, #tpu.memory_space<vmem>>, %arg11: memref<1x32xf32, #tpu.memory_space<vmem>>, %arg12: memref<1x32xf32, #tpu.memory_space<vmem>>, %arg13: memref<1x32xf32, #tpu.memory_space<vmem>>, %arg14: memref<1x32xf32, #tpu.memory_space<vmem>>, %arg15: memref<32x64xbf16, #tpu.memory_space<vmem>>, %arg16: memref<1x64xf32, #tpu.memory_space<vmem>>, %arg17: memref<64x32xbf16, #tpu.memory_space<vmem>>, %arg18: memref<1x32xf32, #tpu.memory_space<vmem>>, %arg19: memref<1x8x32xf32, #tpu.memory_space<vmem>>, %arg20: memref<1x8x8xf32, #tpu.memory_space<vmem>>) attributes {dimension_semantics = [#tpu.dimension_semantics<parallel>, #tpu.dimension_semantics<parallel>], iteration_bounds = array<i64: 2, 1>, scalar_prefetch = 0 : i64, scratch_operands = 0 : i64, tpu.core_type = #tpu.core_type<tc>, window_params = [{transform_indices = @transform_0, window_bounds = array<i64: 1, 8, 32>}, {transform_indices = @transform_1, window_bounds = array<i64: 1, 4, 8, 8>}, {transform_indices = @transform_2, window_bounds = array<i64: 1, 4, 8, 8>}, {pipeline_mode = #tpu.pipeline_mode<synchronous>, transform_indices = @transform_3, window_bounds = array<i64: 32, 32>}, {pipeline_mode = #tpu.pipeline_mode<synchronous>, transform_indices = @transform_4, window_bounds = array<i64: 1, 32>}, {pipeline_mode = #tpu.pipeline_mode<synchronous>, transform_indices = @transform_5, window_bounds = array<i64: 4, 8, 32>}, {pipeline_mode = #tpu.pipeline_mode<synchronous>, transform_indices = @transform_6, window_bounds = array<i64: 1, 32>}, {pipeline_mode = #tpu.pipeline_mode<synchronous>, transform_indices = @transform_7, window_bounds = array<i64: 1, 32>}, {pipeline_mode = #tpu.pipeline_mode<synchronous>, transform_indices = @transform_8, window_bounds = array<i64: 1, 32>}, {pipeline_mode = #tpu.pipeline_mode<synchronous>, transform_indices = @transform_9, window_bounds = array<i64: 1, 32>}, {pipeline_mode = #tpu.pipeline_mode<synchronous>, transform_indices = @transform_10, window_bounds = array<i64: 1, 32>}, {pipeline_mode = #tpu.pipeline_mode<synchronous>, transform_indices = @transform_11, window_bounds = array<i64: 1, 32>}, {pipeline_mode = #tpu.pipeline_mode<synchronous>, transform_indices = @transform_12, window_bounds = array<i64: 1, 32>}, {pipeline_mode = #tpu.pipeline_mode<synchronous>, transform_indices = @transform_13, window_bounds = array<i64: 32, 64>}, {pipeline_mode = #tpu.pipeline_mode<synchronous>, transform_indices = @transform_14, window_bounds = array<i64: 1, 64>}, {pipeline_mode = #tpu.pipeline_mode<synchronous>, transform_indices = @transform_15, window_bounds = array<i64: 64, 32>}, {pipeline_mode = #tpu.pipeline_mode<synchronous>, transform_indices = @transform_16, window_bounds = array<i64: 1, 32>}, {transform_indices = @transform_17, window_bounds = array<i64: 1, 8, 32>}, {transform_indices = @transform_18, window_bounds = array<i64: 1, 8, 8>}]} {
    %c0 = arith.constant 0 : index
    %c0_0 = arith.constant 0 : index
    %c0_1 = arith.constant 0 : index
    %0 = vector.load %arg2[%c0, %c0_0, %c0_1] : memref<1x8x32xf32, #tpu.memory_space<vmem>>, vector<1x8x32xf32>
    %1 = vector.shape_cast %0 : vector<1x8x32xf32> to vector<8x32xf32>
    %c0_2 = arith.constant 0 : index
    %c0_3 = arith.constant 0 : index
    %2 = vector.load %arg9[%c0_2, %c0_3] : memref<1x32xf32, #tpu.memory_space<vmem>>, vector<1x32xf32>
    %c0_4 = arith.constant 0 : index
    %c0_5 = arith.constant 0 : index
    %3 = vector.load %arg10[%c0_4, %c0_5] : memref<1x32xf32, #tpu.memory_space<vmem>>, vector<1x32xf32>
    %cst = arith.constant dense<0.000000e+00> : vector<8xf32>
    %4 = vector.multi_reduction <add>, %1, %cst [1] : vector<8x32xf32> to vector<8xf32>
    %5 = vector.shape_cast %4 : vector<8xf32> to vector<8x1xf32>
    %cst_6 = arith.constant 3.200000e+01 : f32
    %6 = vector.broadcast %cst_6 : f32 to vector<8x1xf32>
    %7 = arith.divf %5, %6 : vector<8x1xf32>
    %8 = vector.broadcast %7 : vector<8x1xf32> to vector<8x32xf32>
    %9 = arith.subf %1, %8 : vector<8x32xf32>
    %10 = arith.mulf %9, %9 : vector<8x32xf32>
    %cst_7 = arith.constant dense<0.000000e+00> : vector<8xf32>
    %11 = vector.multi_reduction <add>, %10, %cst_7 [1] : vector<8x32xf32> to vector<8xf32>
    %12 = vector.shape_cast %11 : vector<8xf32> to vector<8x1xf32>
    %cst_8 = arith.constant 3.200000e+01 : f32
    %13 = vector.broadcast %cst_8 : f32 to vector<8x1xf32>
    %14 = arith.divf %12, %13 : vector<8x1xf32>
    %cst_9 = arith.constant 9.99999974E-6 : f32
    %15 = vector.broadcast %cst_9 : f32 to vector<8x1xf32>
    %16 = arith.addf %14, %15 : vector<8x1xf32>
    %17 = math.rsqrt %16 : vector<8x1xf32>
    %18 = vector.broadcast %17 : vector<8x1xf32> to vector<8x32xf32>
    %19 = arith.mulf %9, %18 : vector<8x32xf32>
    %20 = vector.broadcast %2 : vector<1x32xf32> to vector<8x32xf32>
    %21 = arith.mulf %19, %20 : vector<8x32xf32>
    %22 = vector.broadcast %3 : vector<1x32xf32> to vector<8x32xf32>
    %23 = arith.addf %21, %22 : vector<8x32xf32>
    %24 = arith.truncf %23 : vector<8x32xf32> to vector<8x32xbf16>
    %c0_10 = arith.constant 0 : index
    %c0_11 = arith.constant 0 : index
    %25 = vector.load %arg5[%c0_10, %c0_11] : memref<32x32xbf16, #tpu.memory_space<vmem>>, vector<32x32xbf16>
    %cst_12 = arith.constant dense<0.000000e+00> : vector<8x32xf32>
    %26 = tpu.matmul %24, %25, %cst_12 {dimension_numbers = #tpu.dot_dimension_numbers<[1], [0], [0], [1], [0, 0, 1, 1], [], []>} : vector<8x32xbf16>, vector<32x32xbf16>, vector<8x32xf32> -> vector<8x32xf32>
    %c0_13 = arith.constant 0 : index
    %c0_14 = arith.constant 0 : index
    %27 = vector.load %arg6[%c0_13, %c0_14] : memref<1x32xf32, #tpu.memory_space<vmem>>, vector<1x32xf32>
    %28 = vector.broadcast %27 : vector<1x32xf32> to vector<8x32xf32>
    %29 = arith.addf %26, %28 : vector<8x32xf32>
    %30 = arith.truncf %29 : vector<8x32xf32> to vector<8x32xbf16>
    %31 = vector.shape_cast %30 : vector<8x32xbf16> to vector<8x4x8xbf16>
    %32 = tpu.transpose %31, [1, 0, 2] : vector<8x4x8xbf16> -> vector<4x8x8xbf16>
    %c0_15 = arith.constant 0 : index
    %c0_16 = arith.constant 0 : index
    %c0_17 = arith.constant 0 : index
    %c0_18 = arith.constant 0 : index
    %33 = vector.load %arg3[%c0_15, %c0_16, %c0_17, %c0_18] : memref<1x4x8x8xbf16, #tpu.memory_space<vmem>>, vector<1x4x8x8xbf16>
    %34 = vector.shape_cast %33 : vector<1x4x8x8xbf16> to vector<4x8x8xbf16>
    %c0_19 = arith.constant 0 : index
    %c0_20 = arith.constant 0 : index
    %c0_21 = arith.constant 0 : index
    %c0_22 = arith.constant 0 : index
    %35 = vector.load %arg4[%c0_19, %c0_20, %c0_21, %c0_22] : memref<1x4x8x8xbf16, #tpu.memory_space<vmem>>, vector<1x4x8x8xbf16>
    %36 = vector.shape_cast %35 : vector<1x4x8x8xbf16> to vector<4x8x8xbf16>
    "tpu.trace_start"() <{level = 10 : i32, message = "hld,hsd->hls"}> : () -> ()
    %cst_23 = arith.constant dense<0.000000e+00> : vector<4x8x8xf32>
    %37 = tpu.matmul %32, %34, %cst_23 {dimension_numbers = #tpu.dot_dimension_numbers<[2], [2], [1], [1], [0, 0, 0, 1, 1, 1], [0], [0]>} : vector<4x8x8xbf16>, vector<4x8x8xbf16>, vector<4x8x8xf32> -> vector<4x8x8xf32>
    "tpu.trace_stop"() : () -> ()
    %cst_24 = arith.constant dense<0xFF800000> : vector<4x8xf32>
    %38 = vector.multi_reduction <maximumf>, %37, %cst_24 [2] : vector<4x8x8xf32> to vector<4x8xf32>
    %39 = vector.shape_cast %38 : vector<4x8xf32> to vector<4x8x1xf32>
    %40 = vector.broadcast %39 : vector<4x8x1xf32> to vector<4x8x8xf32>
    %41 = arith.subf %37, %40 : vector<4x8x8xf32>
    %42 = math.exp %41 : vector<4x8x8xf32>
    %cst_25 = arith.constant dense<0.000000e+00> : vector<4x8xf32>
    %43 = vector.multi_reduction <add>, %42, %cst_25 [2] : vector<4x8x8xf32> to vector<4x8xf32>
    %44 = vector.shape_cast %43 : vector<4x8xf32> to vector<4x8x1xf32>
    %cst_26 = arith.constant 1.000000e+00 : f32
    %45 = vector.broadcast %cst_26 : f32 to vector<4x8x1xf32>
    %46 = arith.divf %45, %44 : vector<4x8x1xf32>
    %47 = vector.broadcast %46 : vector<4x8x1xf32> to vector<4x8x8xf32>
    %48 = arith.mulf %42, %47 : vector<4x8x8xf32>
    %cst_27 = arith.constant dense<0.000000e+00> : vector<8x8xf32>
    %49 = vector.multi_reduction <add>, %48, %cst_27 [0] : vector<4x8x8xf32> to vector<8x8xf32>
    %cst_28 = arith.constant 4.000000e+00 : f32
    %50 = vector.broadcast %cst_28 : f32 to vector<8x8xf32>
    %51 = arith.divf %49, %50 : vector<8x8xf32>
    %c0_29 = arith.constant 0 : index
    %c0_30 = arith.constant 0 : index
    %c0_31 = arith.constant 0 : index
    %52 = vector.load %arg20[%c0_29, %c0_30, %c0_31] : memref<1x8x8xf32, #tpu.memory_space<vmem>>, vector<1x8x8xf32>
    %53 = vector.shape_cast %52 : vector<1x8x8xf32> to vector<8x8xf32>
    %54 = vector.shape_cast %51 : vector<8x8xf32> to vector<1x8x8xf32>
    tpu.vector_store %arg20[%c0_29, %c0_30, %c0_31], %54 {strides = array<i32>} : memref<1x8x8xf32, #tpu.memory_space<vmem>>, vector<1x8x8xf32>,
    %55 = arith.truncf %48 : vector<4x8x8xf32> to vector<4x8x8xbf16>
    "tpu.trace_start"() <{level = 10 : i32, message = "hls,hsd->hld"}> : () -> ()
    %cst_32 = arith.constant dense<0.000000e+00> : vector<4x8x8xf32>
    %56 = tpu.matmul %55, %36, %cst_32 {dimension_numbers = #tpu.dot_dimension_numbers<[2], [1], [1], [2], [0, 0, 0, 1, 1, 2], [0], [0]>} : vector<4x8x8xbf16>, vector<4x8x8xbf16>, vector<4x8x8xf32> -> vector<4x8x8xf32>
    "tpu.trace_stop"() : () -> ()
    %57 = arith.truncf %56 : vector<4x8x8xf32> to vector<4x8x8xbf16>
    %c0_33 = arith.constant 0 : index
    %c0_34 = arith.constant 0 : index
    %c0_35 = arith.constant 0 : index
    %58 = vector.load %arg7[%c0_33, %c0_34, %c0_35] : memref<4x8x32xbf16, #tpu.memory_space<vmem>>, vector<4x8x32xbf16>
    "tpu.trace_start"() <{level = 10 : i32, message = "hld,hde->hle"}> : () -> ()
    %cst_36 = arith.constant dense<0.000000e+00> : vector<4x8x32xf32>
    %59 = tpu.matmul %57, %58, %cst_36 {dimension_numbers = #tpu.dot_dimension_numbers<[2], [1], [1], [2], [0, 0, 0, 1, 1, 2], [0], [0]>} : vector<4x8x8xbf16>, vector<4x8x32xbf16>, vector<4x8x32xf32> -> vector<4x8x32xf32>
    "tpu.trace_stop"() : () -> ()
    %cst_37 = arith.constant dense<0.000000e+00> : vector<8x32xf32>
    %60 = vector.multi_reduction <add>, %59, %cst_37 [0] : vector<4x8x32xf32> to vector<8x32xf32>
    %c0_38 = arith.constant 0 : index
    %c0_39 = arith.constant 0 : index
    %61 = vector.load %arg8[%c0_38, %c0_39] : memref<1x32xf32, #tpu.memory_space<vmem>>, vector<1x32xf32>
    %62 = vector.broadcast %61 : vector<1x32xf32> to vector<8x32xf32>
    %63 = arith.addf %60, %62 : vector<8x32xf32>
    %64 = arith.addf %23, %63 : vector<8x32xf32>
    %c0_40 = arith.constant 0 : index
    %c0_41 = arith.constant 0 : index
    %65 = vector.load %arg11[%c0_40, %c0_41] : memref<1x32xf32, #tpu.memory_space<vmem>>, vector<1x32xf32>
    %c0_42 = arith.constant 0 : index
    %c0_43 = arith.constant 0 : index
    %66 = vector.load %arg12[%c0_42, %c0_43] : memref<1x32xf32, #tpu.memory_space<vmem>>, vector<1x32xf32>
    %cst_44 = arith.constant dense<0.000000e+00> : vector<8xf32>
    %67 = vector.multi_reduction <add>, %64, %cst_44 [1] : vector<8x32xf32> to vector<8xf32>
    %68 = vector.shape_cast %67 : vector<8xf32> to vector<8x1xf32>
    %cst_45 = arith.constant 3.200000e+01 : f32
    %69 = vector.broadcast %cst_45 : f32 to vector<8x1xf32>
    %70 = arith.divf %68, %69 : vector<8x1xf32>
    %71 = vector.broadcast %70 : vector<8x1xf32> to vector<8x32xf32>
    %72 = arith.subf %64, %71 : vector<8x32xf32>
    %73 = arith.mulf %72, %72 : vector<8x32xf32>
    %cst_46 = arith.constant dense<0.000000e+00> : vector<8xf32>
    %74 = vector.multi_reduction <add>, %73, %cst_46 [1] : vector<8x32xf32> to vector<8xf32>
    %75 = vector.shape_cast %74 : vector<8xf32> to vector<8x1xf32>
    %cst_47 = arith.constant 3.200000e+01 : f32
    %76 = vector.broadcast %cst_47 : f32 to vector<8x1xf32>
    %77 = arith.divf %75, %76 : vector<8x1xf32>
    %cst_48 = arith.constant 9.99999974E-6 : f32
    %78 = vector.broadcast %cst_48 : f32 to vector<8x1xf32>
    %79 = arith.addf %77, %78 : vector<8x1xf32>
    %80 = math.rsqrt %79 : vector<8x1xf32>
    %81 = vector.broadcast %80 : vector<8x1xf32> to vector<8x32xf32>
    %82 = arith.mulf %72, %81 : vector<8x32xf32>
    %83 = vector.broadcast %65 : vector<1x32xf32> to vector<8x32xf32>
    %84 = arith.mulf %82, %83 : vector<8x32xf32>
    %85 = vector.broadcast %66 : vector<1x32xf32> to vector<8x32xf32>
    %86 = arith.addf %84, %85 : vector<8x32xf32>
    %87 = arith.truncf %86 : vector<8x32xf32> to vector<8x32xbf16>
    %c0_49 = arith.constant 0 : index
    %c0_50 = arith.constant 0 : index
    %88 = vector.load %arg15[%c0_49, %c0_50] : memref<32x64xbf16, #tpu.memory_space<vmem>>, vector<32x64xbf16>
    %cst_51 = arith.constant dense<0.000000e+00> : vector<8x64xf32>
    %89 = tpu.matmul %87, %88, %cst_51 {dimension_numbers = #tpu.dot_dimension_numbers<[1], [0], [0], [1], [0, 0, 1, 1], [], []>} : vector<8x32xbf16>, vector<32x64xbf16>, vector<8x64xf32> -> vector<8x64xf32>
    %c0_52 = arith.constant 0 : index
    %c0_53 = arith.constant 0 : index
    %90 = vector.load %arg16[%c0_52, %c0_53] : memref<1x64xf32, #tpu.memory_space<vmem>>, vector<1x64xf32>
    %91 = vector.broadcast %90 : vector<1x64xf32> to vector<8x64xf32>
    %92 = arith.addf %89, %91 : vector<8x64xf32>
    %cst_54 = arith.constant 0.000000e+00 : f32
    %93 = vector.broadcast %cst_54 : f32 to vector<8x64xf32>
    %94 = arith.maximumf %92, %93 : vector<8x64xf32>
    %95 = arith.truncf %94 : vector<8x64xf32> to vector<8x64xbf16>
    %c0_55 = arith.constant 0 : index
    %c0_56 = arith.constant 0 : index
    %96 = vector.load %arg17[%c0_55, %c0_56] : memref<64x32xbf16, #tpu.memory_space<vmem>>, vector<64x32xbf16>
    %cst_57 = arith.constant dense<0.000000e+00> : vector<8x32xf32>
    %97 = tpu.matmul %95, %96, %cst_57 {dimension_numbers = #tpu.dot_dimension_numbers<[1], [0], [0], [1], [0, 0, 1, 1], [], []>} : vector<8x64xbf16>, vector<64x32xbf16>, vector<8x32xf32> -> vector<8x32xf32>
    %c0_58 = arith.constant 0 : index
    %c0_59 = arith.constant 0 : index
    %98 = vector.load %arg18[%c0_58, %c0_59] : memref<1x32xf32, #tpu.memory_space<vmem>>, vector<1x32xf32>
    %99 = vector.broadcast %98 : vector<1x32xf32> to vector<8x32xf32>
    %100 = arith.addf %97, %99 : vector<8x32xf32>
    %101 = arith.addf %86, %100 : vector<8x32xf32>
    %c0_60 = arith.constant 0 : index
    %c0_61 = arith.constant 0 : index
    %102 = vector.load %arg13[%c0_60, %c0_61] : memref<1x32xf32, #tpu.memory_space<vmem>>, vector<1x32xf32>
    %c0_62 = arith.constant 0 : index
    %c0_63 = arith.constant 0 : index
    %103 = vector.load %arg14[%c0_62, %c0_63] : memref<1x32xf32, #tpu.memory_space<vmem>>, vector<1x32xf32>
    %cst_64 = arith.constant dense<0.000000e+00> : vector<8xf32>
    %104 = vector.multi_reduction <add>, %101, %cst_64 [1] : vector<8x32xf32> to vector<8xf32>
    %105 = vector.shape_cast %104 : vector<8xf32> to vector<8x1xf32>
    %cst_65 = arith.constant 3.200000e+01 : f32
    %106 = vector.broadcast %cst_65 : f32 to vector<8x1xf32>
    %107 = arith.divf %105, %106 : vector<8x1xf32>
    %108 = vector.broadcast %107 : vector<8x1xf32> to vector<8x32xf32>
    %109 = arith.subf %101, %108 : vector<8x32xf32>
    %110 = arith.mulf %109, %109 : vector<8x32xf32>
    %cst_66 = arith.constant dense<0.000000e+00> : vector<8xf32>
    %111 = vector.multi_reduction <add>, %110, %cst_66 [1] : vector<8x32xf32> to vector<8xf32>
    %112 = vector.shape_cast %111 : vector<8xf32> to vector<8x1xf32>
    %cst_67 = arith.constant 3.200000e+01 : f32
    %113 = vector.broadcast %cst_67 : f32 to vector<8x1xf32>
    %114 = arith.divf %112, %113 : vector<8x1xf32>
    %cst_68 = arith.constant 9.99999974E-6 : f32
    %115 = vector.broadcast %cst_68 : f32 to vector<8x1xf32>
    %116 = arith.addf %114, %115 : vector<8x1xf32>
    %117 = math.rsqrt %116 : vector<8x1xf32>
    %118 = vector.broadcast %117 : vector<8x1xf32> to vector<8x32xf32>
    %119 = arith.mulf %109, %118 : vector<8x32xf32>
    %120 = vector.broadcast %102 : vector<1x32xf32> to vector<8x32xf32>
    %121 = arith.mulf %119, %120 : vector<8x32xf32>
    %122 = vector.broadcast %103 : vector<1x32xf32> to vector<8x32xf32>
    %123 = arith.addf %121, %122 : vector<8x32xf32>
    %c0_69 = arith.constant 0 : index
    %c0_70 = arith.constant 0 : index
    %c0_71 = arith.constant 0 : index
    %124 = vector.load %arg19[%c0_69, %c0_70, %c0_71] : memref<1x8x32xf32, #tpu.memory_space<vmem>>, vector<1x8x32xf32>
    %125 = vector.shape_cast %124 : vector<1x8x32xf32> to vector<8x32xf32>
    %126 = vector.shape_cast %123 : vector<8x32xf32> to vector<1x8x32xf32>
    tpu.vector_store %arg19[%c0_69, %c0_70, %c0_71], %126 {strides = array<i32>} : memref<1x8x32xf32, #tpu.memory_space<vmem>>, vector<1x8x32xf32>,
    return
  }
  func.func @transform_0(%arg0: i32, %arg1: i32) -> (i32, i32, i32) {
    %c0_i32 = arith.constant 0 : i32
    %c0_i32_0 = arith.constant 0 : i32
    return %arg0, %arg1, %c0_i32 : i32, i32, i32
  }
  func.func @transform_1(%arg0: i32, %arg1: i32) -> (i32, i32, i32, i32) {
    %c0_i32 = arith.constant 0 : i32
    %c0_i32_0 = arith.constant 0 : i32
    %c0_i32_1 = arith.constant 0 : i32
    %c0_i32_2 = arith.constant 0 : i32
    return %arg0, %c0_i32, %c0_i32_0, %c0_i32_1 : i32, i32, i32, i32
  }
  func.func @transform_2(%arg0: i32, %arg1: i32) -> (i32, i32, i32, i32) {
    %c0_i32 = arith.constant 0 : i32
    %c0_i32_0 = arith.constant 0 : i32
    %c0_i32_1 = arith.constant 0 : i32
    %c0_i32_2 = arith.constant 0 : i32
    return %arg0, %c0_i32, %c0_i32_0, %c0_i32_1 : i32, i32, i32, i32
  }
  func.func @transform_3(%arg0: i32, %arg1: i32) -> (i32, i32) {
    %c0_i32 = arith.constant 0 : i32
    %c0_i32_0 = arith.constant 0 : i32
    %c0_i32_1 = arith.constant 0 : i32
    return %c0_i32, %c0_i32_0 : i32, i32
  }
  func.func @transform_4(%arg0: i32, %arg1: i32) -> (i32, i32) {
    %c0_i32 = arith.constant 0 : i32
    %c0_i32_0 = arith.constant 0 : i32
    %c0_i32_1 = arith.constant 0 : i32
    return %c0_i32, %c0_i32_0 : i32, i32
  }
  func.func @transform_5(%arg0: i32, %arg1: i32) -> (i32, i32, i32) {
    %c0_i32 = arith.constant 0 : i32
    %c0_i32_0 = arith.constant 0 : i32
    %c0_i32_1 = arith.constant 0 : i32
    %c0_i32_2 = arith.constant 0 : i32
    return %c0_i32, %c0_i32_0, %c0_i32_1 : i32, i32, i32
  }
  func.func @transform_6(%arg0: i32, %arg1: i32) -> (i32, i32) {
    %c0_i32 = arith.constant 0 : i32
    %c0_i32_0 = arith.constant 0 : i32
    %c0_i32_1 = arith.constant 0 : i32
    return %c0_i32, %c0_i32_0 : i32, i32
  }
  func.func @transform_7(%arg0: i32, %arg1: i32) -> (i32, i32) {
    %c0_i32 = arith.constant 0 : i32
    %c0_i32_0 = arith.constant 0 : i32
    %c0_i32_1 = arith.constant 0 : i32
    return %c0_i32, %c0_i32_0 : i32, i32
  }
  func.func @transform_8(%arg0: i32, %arg1: i32) -> (i32, i32) {
    %c0_i32 = arith.constant 0 : i32
    %c0_i32_0 = arith.constant 0 : i32
    %c0_i32_1 = arith.constant 0 : i32
    return %c0_i32, %c0_i32_0 : i32, i32
  }
  func.func @transform_9(%arg0: i32, %arg1: i32) -> (i32, i32) {
    %c0_i32 = arith.constant 0 : i32
    %c0_i32_0 = arith.constant 0 : i32
    %c0_i32_1 = arith.constant 0 : i32
    return %c0_i32, %c0_i32_0 : i32, i32
  }
  func.func @transform_10(%arg0: i32, %arg1: i32) -> (i32, i32) {
    %c0_i32 = arith.constant 0 : i32
    %c0_i32_0 = arith.constant 0 : i32
    %c0_i32_1 = arith.constant 0 : i32
    return %c0_i32, %c0_i32_0 : i32, i32
  }
  func.func @transform_11(%arg0: i32, %arg1: i32) -> (i32, i32) {
    %c0_i32 = arith.constant 0 : i32
    %c0_i32_0 = arith.constant 0 : i32
    %c0_i32_1 = arith.constant 0 : i32
    return %c0_i32, %c0_i32_0 : i32, i32
  }
  func.func @transform_12(%arg0: i32, %arg1: i32) -> (i32, i32) {
    %c0_i32 = arith.constant 0 : i32
    %c0_i32_0 = arith.constant 0 : i32
    %c0_i32_1 = arith.constant 0 : i32
    return %c0_i32, %c0_i32_0 : i32, i32
  }
  func.func @transform_13(%arg0: i32, %arg1: i32) -> (i32, i32) {
    %c0_i32 = arith.constant 0 : i32
    %c0_i32_0 = arith.constant 0 : i32
    %c0_i32_1 = arith.constant 0 : i32
    return %c0_i32, %c0_i32_0 : i32, i32
  }
  func.func @transform_14(%arg0: i32, %arg1: i32) -> (i32, i32) {
    %c0_i32 = arith.constant 0 : i32
    %c0_i32_0 = arith.constant 0 : i32
    %c0_i32_1 = arith.constant 0 : i32
    return %c0_i32, %c0_i32_0 : i32, i32
  }
  func.func @transform_15(%arg0: i32, %arg1: i32) -> (i32, i32) {
    %c0_i32 = arith.constant 0 : i32
    %c0_i32_0 = arith.constant 0 : i32
    %c0_i32_1 = arith.constant 0 : i32
    return %c0_i32, %c0_i32_0 : i32, i32
  }
  func.func @transform_16(%arg0: i32, %arg1: i32) -> (i32, i32) {
    %c0_i32 = arith.constant 0 : i32
    %c0_i32_0 = arith.constant 0 : i32
    %c0_i32_1 = arith.constant 0 : i32
    return %c0_i32, %c0_i32_0 : i32, i32
  }
  func.func @transform_17(%arg0: i32, %arg1: i32) -> (i32, i32, i32) {
    %c0_i32 = arith.constant 0 : i32
    %c0_i32_0 = arith.constant 0 : i32
    return %arg0, %arg1, %c0_i32 : i32, i32, i32
  }
  func.func @transform_18(%arg0: i32, %arg1: i32) -> (i32, i32, i32) {
    %c0_i32 = arith.constant 0 : i32
    %c0_i32_0 = arith.constant 0 : i32
    return %arg0, %arg1, %c0_i32 : i32, i32, i32
  }
}

</mosaic_0001>

<bundles_post_ra>
// kernel: tpu_custom_call.1
= control target key start
LH: loop header
LB: loop body
LE: loop exit
PB: predicated region body
PF: predicated region fallthrough
CT: control target
= control target key end

     0   :  { %s3390_s0 = inlined_call_operand.vmem [shape: f32[2,8,32], index: 0, kind: input, shape index: {}]   ;;  %s3391_s1 = inlined_call_operand.vmem [shape: bf16[2,4,8,8], index: 1, kind: input, shape index: {}]   ;;  %s3392_s2 = inlined_call_operand.hbm [shape: bf16[2,4,8,8], index: 2, kind: input, shape index: {}]   ;;  %s3393_s3 = inlined_call_operand.hbm [shape: bf16[32,32], index: 3, kind: input, shape index: {}]   ;;  %s3394_s4 = inlined_call_operand.hbm [shape: f32[1,32], index: 4, kind: input, shape index: {}]   ;;  %s3395_s5 = inlined_call_operand.hbm [shape: bf16[4,8,32], index: 5, kind: input, shape index: {}]   ;;  %s3396_s6 = inlined_call_operand.hbm [shape: f32[1,32], index: 6, kind: input, shape index: {}]   ;;  %s3397_s7 = inlined_call_operand.hbm [shape: f32[1,32], index: 7, kind: input, shape index: {}]   ;;  %s3398_s8 = inlined_call_operand.hbm [shape: f32[1,32], index: 8, kind: input, shape index: {}]   ;;  %s3399_s9 = inlined_call_operand.hbm [shape: f32[1,32], index: 9, kind: input, shape index: {}]   ;;  %s3400_s10 = inlined_call_operand.vmem [shape: f32[1,32], index: 10, kind: input, shape index: {}]   ;;  %s3401_s11 = inlined_call_operand.vmem [shape: f32[1,32], index: 11, kind: input, shape index: {}]   ;;  %s3402_s12 = inlined_call_operand.vmem [shape: f32[1,32], index: 12, kind: input, shape index: {}]   ;;  %s3403_s13 = inlined_call_operand.vmem [shape: bf16[32,64], index: 13, kind: input, shape index: {}]   ;;  %s3404_s14 = inlined_call_operand.vmem [shape: f32[1,64], index: 14, kind: input, shape index: {}]   ;;  %s3405_s15 = inlined_call_operand.vmem [shape: bf16[64,32], index: 15, kind: input, shape index: {}]   ;;  %s3406_s16 = inlined_call_operand.vmem [shape: f32[1,32], index: 16, kind: input, shape index: {}]   ;;  %s3407_s17 = inlined_call_operand.hbm [shape: f32[2,8,32], index: 17, kind: output, shape index: {0}]   ;;  %s3408_s18 = inlined_call_operand.hbm [shape: f32[2,8,8], index: 18, kind: output, shape index: {1}]  }
   0x1   :  { %3416 = sst [smem:[#allocation27_spill]] %s3390_s0 }
   0x2   :  { %3417 = sst [smem:[#allocation28_spill]] %s3391_s1 }
   0x3   :  { %3418 = sst [smem:[#allocation29_spill]] %s3392_s2 }
   0x4   :  { %3419 = sst [smem:[#allocation30_spill]] %s3393_s3 }
   0x5   :  { %3420 = sst [smem:[#allocation31_spill]] %s3394_s4 }
   0x6   :  { %3421 = sst [smem:[#allocation32_spill]] %s3395_s5 }
   0x7   :  { %3422 = sst [smem:[#allocation33_spill]] %s3396_s6 }
   0x8   :  { %3423 = sst [smem:[#allocation34_spill]] %s3397_s7 }
   0x9   :  { %3424 = sst [smem:[#allocation35_spill]] %s3398_s8 }
   0xa   :  { %3425 = sst [smem:[#allocation36_spill]] %s3399_s9 }
   0xb   :  { %3426 = sst [smem:[#allocation37_spill]] %s3401_s11 }
   0xc   :  { %3427 = sst [smem:[#allocation38_spill]] %s3402_s12 }
   0xd   :  { %3428 = sst [smem:[#allocation39_spill]] %s3406_s16 }
   0xe   :  { %3429 = sst [smem:[#allocation40_spill]] %s3407_s17 }
   0xf   :  { %3430 = sst [smem:[#allocation41_spill]] %s3408_s18 }
  0x10   :  { %24 = vsyncpa [#allocation3], 0 }
  0x11   :  { %26 = vsyncpa [#allocation3 + $0x1], 0 }
  0x12   :  { %27 = vsyncpa [#allocation6], 0 }
  0x13   :  { %28 = vsyncpa [#allocation9], 0 }
  0x14   :  { %29 = vsyncpa [#allocation12], 0 }
  0x15   :  { %30 = vsyncpa [#allocation15], 0 }
  0x16   :  { %31 = vsyncpa [#allocation4], 0 }
  0x17   :  { %33 = vsyncpa [#allocation4 + $0x1], 0 }
  0x18   :  { %34 = vsyncpa [#allocation18], 0 }
  0x19   :  { %36 = vsyncpa [#allocation18 + $0x1], 0  ;;  %s2965_s27 = smov 0   ;;  %s2967_s28 = smov 0  }
  0x1a   :  { %s2969_s29 = smov 0   ;;  %s2971_s30 = smov 0  }
  0x1b   :  { %s2973_s0 = smov 0   ;;  %s2975_s19 = smov 0  }
  0x1c LB: > { %s3409_s1 = sadd.s32 4294967295, %s2848_s19   ;;  %p2132_p0 = scmp.ge.s32.totalorder %s2848_s19, 1  ;;  %s2848_s19 = sphi %s2975_s19, %s42_s19   ;;  %s2844_s0 = sphi %s2973_s0, %s3467_s0   ;;  %s2840_s30 = sphi %s2971_s30, %s3466_s30   ;;  %s2836_s29 = sphi %s2969_s29, %s3465_s29   ;;  %s2832_s28 = sphi %s2967_s28, %s3464_s28   ;;  %s2828_s27 = sphi %s2965_s27, %s3463_s27  }
  0x1d   : > { %p2999_p1 = scmp.eq.s32.totalorder %s3409_s1, 0  ;;  %p489_p2 = scmp.lt.s32.totalorder %s2848_s19, 3 }
  0x1e   : > { %s2850_s22 = smov [#allocation5]   ;;  %s2851_s24 = smov [#allocation8]  }
  0x1f   : > { %p3004_p3 = pnand %p2132_p0, %p489_p2  ;;  %s501_s2 = sshll.u32 %s2850_s22, 4  ;;  %s502_s2 = int_to_ptr.vmem [resolvable:$true] %s501_s2 }
  0x20   : > { %s525_s25 = sshll.u32 %s2851_s24, 4  ;;  %s2852_s26 = smov [#allocation11]   ;;  %s526_s25 = int_to_ptr.vmem [resolvable:$true] %s525_s25 }
  0x21   : > { %s3432_s21 = scalar_select %p3004_p3, 1, 0 }
  0x22   : > { %p2368_p4 = pneg %p3004_p3  ;;  %s550_s1 = sshll.u32 %s2852_s26, 4  ;;  %s551_s1 = int_to_ptr.vmem [resolvable:$true] %s550_s1 }
  0x23   : > { %s2523_s22 = scalar_lea.vmem %s502_s2, 256  ;;  %p2531_p11 = scmp.lt.s32.totalorder %s502_s2, %s502_s2 }
  0x24   : > { %p3013_p6 = pnand %p2368_p4, %p2999_p1  ;;  %p2524_p8 = scmp.ne.s32.totalorder %s502_s2, %s2523_s22 }
  0x25   : > { %p2532_p12 = scmp.lt.s32.totalorder %s2523_s22, %s2523_s22 }
  0x26   : > { %p3019_p7 = pneg %p3013_p6 }
  0x27   : > { %p2533_p13 = por %p2532_p12, %p2531_p11 }
  0x28   : > { %p2526_p9 = pnand %p2524_p8, %p3019_p7 }
  0x2a   : > { %p2527_p10 = pneg %p2526_p9 }
  0x2c   : > { %p2534_p0 = pnand %p2533_p13, %p2527_p10 }
  0x2e   : > { %2537 = shalt.err (!%p2534_p0)
}
  0x2f   : > { %s3412_s24 = smov 64   ;;  %s3413_s26 = smov 4  }
  0x30   : > { %s3435_s3 = sld [smem:[#allocation30_spill]]  ;;  %s2549_s18 = scalar_lea.vmem %s526_s25, 256 }
  0x31   : > { %p2550_p2 = scmp.ne.s32.totalorder %s526_s25, %s2549_s18  ;;  %p2557_p9 = scmp.lt.s32.totalorder %s526_s25, %s526_s25 }
  0x32   : > { %p2558_p10 = scmp.lt.s32.totalorder %s2549_s18, %s2549_s18 }
  0x33   : > { %p2552_p4 = pnand %p2550_p2, %p3019_p7 }
  0x34   : > { %p2559_p11 = por %p2558_p10, %p2557_p9 }
  0x35   : > { %p2553_p8 = pneg %p2552_p4 }
  0x36   : > { %2371 = dma.hbm_to_vmem [thread:$0]  (!%p3013_p6), %s3435_s3, 256, %s502_s2, [#allocation6], %s3412_s24, %s3412_s24, %s3413_s26  }
  0x37   : > { %p2560_p12 = pnand %p2559_p11, %p2553_p8 }
  0x39   : > { %2563 = shalt.err (!%p2560_p12)
}
  0x3a   : > { %s3436_s5 = sld [smem:[#allocation32_spill]]  ;;  %s2575_s11 = scalar_lea.vmem %s551_s1, 16 }
  0x3b   : > { %p2576_p13 = scmp.ne.s32.totalorder %s551_s1, %s2575_s11  ;;  %s2582_s12 = scalar_lea.vmem %s551_s1, 32 }
  0x3c   : > { %p2583_p4 = scmp.lt.s32.totalorder %s551_s1, %s551_s1  ;;  %p2584_p8 = scmp.lt.s32.totalorder %s2582_s12, %s2575_s11 }
  0x3d   : > { %p2578_p0 = pnand %p2576_p13, %p3019_p7 }
  0x3e   : > { %p2585_p9 = por %p2584_p8, %p2583_p4 }
  0x3f   : > { %p2579_p2 = pneg %p2578_p0 }
  0x40   : > { %2377 = dma.hbm_to_vmem [thread:$0]  (!%p3013_p6), %s3436_s5, 256, %s526_s25, [#allocation9], %s3412_s24, %s3412_s24, %s3413_s26  }
  0x41   : > { %p2586_p10 = pnand %p2585_p9, %p2579_p2 }
  0x43   : > { %2589 = shalt.err (!%p2586_p10)
}
  0x44   : > { %s3437_s7 = sld [smem:[#allocation34_spill]]  ;;  %s2855_s16 = smov [#allocation7]  }
  0x45   : > { %s515_s25 = sshll.u32 %s2855_s16, 4  ;;  %s2856_s22 = smov [#allocation10]   ;;  %s516_s25 = int_to_ptr.vmem [resolvable:$true] %s515_s25 }
  0x46   : > { %s539_s24 = sshll.u32 %s2856_s22, 4  ;;  %s2601_s26 = scalar_lea.vmem %s516_s25, 16  ;;  %s540_s24 = int_to_ptr.vmem [resolvable:$true] %s539_s24 }
  0x47   : > { %p2602_p11 = scmp.ne.s32.totalorder %s516_s25, %s2601_s26  ;;  %s2608_s11 = scalar_lea.vmem %s516_s25, 32 }
  0x48   : > { %p2609_p0 = scmp.lt.s32.totalorder %s516_s25, %s516_s25  ;;  %p2610_p2 = scmp.lt.s32.totalorder %s2608_s11, %s2601_s26 }
  0x49   : > { %p2604_p12 = pnand %p2602_p11, %p3019_p7 }
  0x4a   : > { %2383 = dma.hbm_to_vmem [thread:$0]  (!%p3013_p6), %s3437_s7, 16, %s551_s1, [#allocation12]  }
  0x4b   : > { %p2605_p13 = pneg %p2604_p12  ;;  %p2611_p4 = por %p2610_p2, %p2609_p0 }
  0x4d   : > { %p2612_p8 = pnand %p2611_p4, %p2605_p13 }
  0x4f   : > { %2615 = shalt.err (!%p2612_p8)
}
  0x50   : > { %s3438_s4 = sld [smem:[#allocation31_spill]]  ;;  %s2627_s18 = scalar_lea.vmem %s540_s24, 16 }
  0x51   : > { %p2628_p9 = scmp.ne.s32.totalorder %s540_s24, %s2627_s18  ;;  %s2634_s2 = scalar_lea.vmem %s540_s24, 32 }
  0x52   : > { %p2635_p12 = scmp.lt.s32.totalorder %s540_s24, %s540_s24  ;;  %p2636_p5 = scmp.lt.s32.totalorder %s2634_s2, %s2627_s18 }
  0x53   : > { %p2630_p10 = pnand %p2628_p9, %p3019_p7 }
  0x54   : > { %p2637_p3 = por %p2636_p5, %p2635_p12 }
  0x55   : > { %p2631_p11 = pneg %p2630_p10 }
  0x56   : > { %2374 = dma.hbm_to_vmem [thread:$0]  (!%p3013_p6), %s3438_s4, 16, %s516_s25, [#allocation6]  }
  0x57   : > { %p2638_p0 = pnand %p2637_p3, %p2631_p11 }
  0x59   : > { %2641 = shalt.err (!%p2638_p0)
}
  0x5a   : > { %s3439_s6 = sld [smem:[#allocation33_spill]]  ;;  %s2857_s25 = smov [#allocation13]  }
  0x5b   : > { %s561_s22 = sshll.u32 %s2857_s25, 4  ;;  %s2858_s11 = smov [#allocation14]   ;;  %s562_s22 = int_to_ptr.vmem [resolvable:$true] %s561_s22 }
  0x5c   : > { %s572_s12 = sshll.u32 %s2858_s11, 4  ;;  %s2653_s1 = scalar_lea.vmem %s562_s22, 16  ;;  %s573_s12 = int_to_ptr.vmem [resolvable:$true] %s572_s12 }
  0x5d   : > { %p2654_p13 = scmp.ne.s32.totalorder %s562_s22, %s2653_s1  ;;  %s2660_s18 = scalar_lea.vmem %s562_s22, 32 }
  0x5e   : > { %p2661_p3 = scmp.lt.s32.totalorder %s562_s22, %s562_s22  ;;  %p2662_p5 = scmp.lt.s32.totalorder %s2660_s18, %s2653_s1 }
  0x5f   : > { %p2656_p2 = pnand %p2654_p13, %p3019_p7 }
  0x60   : > { %2380 = dma.hbm_to_vmem [thread:$0]  (!%p3013_p6), %s3439_s6, 16, %s540_s24, [#allocation9]  }
  0x61   : > { %p2657_p4 = pneg %p2656_p2  ;;  %p2663_p8 = por %p2662_p5, %p2661_p3 }
  0x63   : > { %p2664_p9 = pnand %p2663_p8, %p2657_p4 }
  0x65   : > { %2667 = shalt.err (!%p2664_p9)
}
  0x66   : > { %s3440_s8 = sld [smem:[#allocation35_spill]]  ;;  %s2679_s26 = scalar_lea.vmem %s573_s12, 16 }
  0x67   : > { %p2680_p10 = scmp.ne.s32.totalorder %s573_s12, %s2679_s26  ;;  %s2686_s16 = scalar_lea.vmem %s573_s12, 32 }
  0x68   : > { %p2687_p0 = scmp.lt.s32.totalorder %s573_s12, %s573_s12  ;;  %p2688_p13 = scmp.lt.s32.totalorder %s2686_s16, %s2679_s26 }
  0x69   : > { %p2682_p11 = pnand %p2680_p10, %p3019_p7 }
  0x6a   : > { %p2689_p2 = por %p2688_p13, %p2687_p0 }
  0x6b   : > { %p2683_p12 = pneg %p2682_p11 }
  0x6c   : > { %2386 = dma.hbm_to_vmem [thread:$0]  (!%p3013_p6), %s3440_s8, 16, %s562_s22, [#allocation12]  }
  0x6d   : > { %p2690_p3 = pnand %p2689_p2, %p2683_p12 }
  0x6f   : > { %2693 = shalt.err (!%p2690_p3)
}
  0x70   : > { %s3441_s9 = sld [smem:[#allocation36_spill]]  ;;  %s2131_s17 = sadd.s32 4294967294, %s2848_s19  }
  0x71   : > { %s54_s22 = sadd.s32 1, %s2844_s0  ;;  %s115_s23 = sadd.s32 1, %s2836_s29 }
  0x72   : > { %p56_p7 = scmp.ge.s32.totalorder %s54_s22, 2  ;;  %p122_p4 = scmp.ne.s32.totalorder %s2836_s29, %s2832_s28 }
  0x73   : > { %p123_p5 = scmp.eq.s32.totalorder %s2848_s19, 0  ;;  %p128_p8 = scmp.ne.s32.totalorder %s2832_s28, %s2828_s27 }
  0x74   : > { %s3469_s22 = smov (%p56_p7, %s54_s22), 0  ;;  %s3445_s2 = sadd.s32 4294967295, %s2848_s19  }
  0x75   : > { %3442 = sst [smem:[#allocation26_spill]] %s3469_s22  ;;  %p3088_p9 = por %p123_p5, %p122_p4 }
  0x76   : > { %2389 = dma.hbm_to_vmem [thread:$0]  (!%p3013_p6), %s3441_s9, 16, %s573_s12, [#allocation15]  }
  0x77   : > { %p3094_p6 = por %p2999_p1, %p128_p8  ;;  %s112_s18 = ssub.s32 %s2844_s0, %s3469_s22 }
  0x78   : > { %p448_p10 = scmp.eq.s32.totalorder %s3445_s2, 1  ;;  %p113_p11 = scmp.eq.s32.totalorder %s112_s18, 0 }
  0x79   : > { %p454_p12 = scmp.eq.s32.totalorder %s2131_s17, 1  ;;  %p2408_p13 = scmp.lt.s32.totalorder %s2848_s19, 2 }
  0x7a   : > { %p3102_p0 = por %p448_p10, %p122_p4  ;;  %s622_s25 = sand.u32 1, %s2836_s29  }
  0x7b   : > { %s3108_s26 = scalar_select %p113_p11, %s2836_s29, %s115_s23  }
  0x7c   : > { %p3110_p2 = por %p454_p12, %p128_p8  ;;  %s2141_s11 = sshll.u32 %s622_s25, 4 }
  0x7d   : > { %s2197_s3 = sshll.u32 %s2844_s0, 8  ;;  %s3448_s6 = sld [smem:[#allocation29_spill]] }
  0x7e   : > { %s3447_s16 = scalar_select %p3110_p2, 1, 0 }
  0x7f   : > { %s626_s18 = scalar_lea.vmem [#allocation2], %s2141_s11  ;;  %p3121_p3 = pnand %p2408_p13, %p3088_p9 }
  0x80   : > { %s633_s17 = sshll.u32 %s626_s18, 4  ;;  %s623_s23 = scalar_lea.sflag [#allocation3], %s622_s25  ;;  %s634_s17 = int_to_ptr.vmem [resolvable:$true] %s633_s17 }
  0x81   : > { %p2696_p7 = pneg %p3121_p3  ;;  %s2707_s8 = scalar_lea.vmem %s634_s17, 256 }
  0x82   : > { %p2708_p4 = scmp.ne.s32.totalorder %s634_s17, %s2707_s8  ;;  %s2859_s9 = smov [#allocation2]  }
  0x83   : > { %s632_s2 = scalar_lea.hbm %s3448_s6, %s2197_s3  ;;  %s2712_s22 = sshll.u32 %s2859_s9, 4  ;;  %s2713_s22 = int_to_ptr.vmem [resolvable:$false] %s2712_s22 }
  0x84   : > { %p2710_p5 = pnand %p2708_p4, %p2696_p7  ;;  %s2714_s3 = scalar_lea.vmem %s2713_s22, 512 }
  0x85   : > { %p2715_p10 = scmp.lt.s32.totalorder %s634_s17, %s2713_s22  ;;  %p2716_p11 = scmp.lt.s32.totalorder %s2714_s3, %s2707_s8 }
  0x86   : > { %p2711_p8 = pneg %p2710_p5 }
  0x87   : > { %p2717_p12 = por %p2716_p11, %p2715_p10 }
  0x89   : > { %p2718_p2 = pnand %p2717_p12, %p2711_p8 }
  0x8b   : > { %2721 = shalt.err (!%p2718_p2)
}
  0x8c   : > { %s3450_s4 = smov 4   ;;  %s3451_s5 = smov 64  }
  0x8d   : > { %2393 = dma.hbm_to_vmem [thread:$0]  (!%p3121_p3), %s632_s2, 256, %s634_s17, %s623_s23, %s3451_s5, %s3451_s5, %s3450_s4  }
  0x8e   : > { %p3452_p9 = scmp.ne.s32.totalorder %s3432_s21, 0 }
  0x8f   : > { %s3135_s6 = sand.u32 (!%p3452_p9), 1, %s2832_s28  }
  0x90   : > { %645 = sbr.rel (%p3452_p9) target bundleno = 2756 (0xac4), region = 88  ;;  %s2145_s9 = sshll.u32 (!%p3452_p9), %s3135_s6, 4 }
  0x91   : > { %s648_s8 = scalar_lea.sflag (!%p3452_p9), [#allocation3], %s3135_s6  ;;  %s3139_s22 = scalar_lea.vmem (!%p3452_p9), [#allocation2], %s2145_s9 }
  0x95   : > { %2799 = dma.done.wait (%p3094_p6), %s648_s8, 256  }
  0x96   : > { %2801 = vsyncadd (%p3094_p6), %s648_s8, 4294967040 }
  0x97   : > { %2803 = dma.done.wait (%p2999_p1), [#allocation6], 272  }
  0x98   : > { %2805 = vsyncadd (%p2999_p1), [#allocation6], 4294967024 }
  0x99   : > { %2807 = dma.done.wait (%p2999_p1), [#allocation9], 272  }
  0x9a   : > { %2809 = vsyncadd (%p2999_p1), [#allocation9], 4294967024 }
  0x9b   : > { %2811 = dma.done.wait (%p2999_p1), [#allocation12], 32  }
  0x9c   : > { %2813 = vsyncadd (%p2999_p1), [#allocation12], 4294967264 }
  0x9d   : > { %2815 = dma.done.wait (%p2999_p1), [#allocation15], 16  }
  0x9e   : > { %2817 = vsyncadd (%p2999_p1), [#allocation15], 4294967280  ;;  %p749_p6 = scmp.lt.s32.totalorder %s2840_s30, 1  ;;  %s3453_s25 = sld [smem:[#allocation27_spill]]  ;;  %vm765_vm0 = vcmask 261120   ;;  %v2482_v7 = vld [vmem:[#allocation5 + $0x8] sm:$0xff]   ;;  %v872_v33 = vlaneseq }
  0x9f   : > { %v2860_v8 = vmov 0.0   ;;  %vm2861_vm1 = vmmov 0   ;;  %v2483_v9 = vld [vmem:[#allocation5] sm:$0xff]   ;;  %v2160_v20 = vld [vmem:[#allocation7] ss:$0 sm:$0xff]  ;;  %s2862_s2 = smov 104  }
  0xa0   : > { %s3163_s7 = scalar_select %p749_p6, %s2840_s30, 1  ;;  %2234 = vmatprep.subr.bf16.mxu1 %v2860_v8  ;;  %2238 = vmatprep.mubr.msk.bf16.mxu1 %vm2861_vm1, %v2860_v8  ;;  %v2158_v14 = vld [vmem:[#allocation11] ss:$0 sm:$0xff]  ;;  %v2159_v16 = vld [vmem:[#allocation13] ss:$0 sm:$0xff]  ;;  %vm1038_vm2 = vcmask 64512  }
  0xa1   : > { %2235 = vmatpush3.bf16.msra.mxu1 %v2482_v7  ;;  %2248 = vmatprep.subr.bf16.mxu0 %v2860_v8  ;;  %s2863_s18 = smov 120   ;;  %s3454_s3 = sld [smem:[#allocation28_spill]]  ;;  %v2865_v31 = vmov 1983009808   ;;  %v2866_v34 = vmov 1934713408  }
  0xa2   : > { %s2155_s21 = sshll.u32 %s3163_s7, 3  ;;  %2236 = vmatprep.subr.bf16.mxu1 %v2860_v8  ;;  %2250 = vmatprep.mubr.msk.bf16.mxu0 %vm2861_vm1, %v2860_v8  ;;  %s2198_s20 = sshll.u32 %s3163_s7, 4  ;;  %v870_v32 = vunpack.c.l.s4 %v2865_v31  ;;  %v887_v35 = vunpack.c.l.s4 %v2866_v34  ;;  %v873_v37 = vshrl.u32 %v872_v33, 7  ;;  %v2867_v54 = vmov 0  }
  0xa3   : > { %s2864_s5 = smov 112   ;;  %vm1288_vm3 = vcmask 1043456   ;;  %s2153_s9 = sshll.u32 %s3135_s6, 3  ;;  %vm1815_vm4 = vcmask 523264  }
  0xa4   : > { %s755_s11 = scalar_lea.vmem %s3453_s25, %s2155_s21  ;;  %v871_v36 = vunpack.c.0.s8 %v870_v32  ;;  %v888_v38 = vunpack.c.0.s8 %v887_v35  ;;  %s3259_s8 = scalar_lea.vmem [#allocation17], %s2153_s9 }
  0xa5   : > { %v762_v0 = vld [vmem:[%s755_s11] sm:$0xff]  ;;  %2237 = vmatpush3.bf16.msra.mxu1 %v2483_v9  ;;  %s3455_s1 = sld [smem:[#allocation39_spill]]  ;;  %s2193_s12 = sshll.u32 %s2840_s30, 7 }
  0xa6   : > { %v766_v1 = vsel %vm765_vm0, %v762_v0, 0.0  ;;  %2242 = vmatprep.subr.bf16.mxu1 %v2860_v8  ;;  %v874_v39 = vsub.s32 %v871_v36, %v873_v37  ;;  %v891_v43 = vsub.s32 %v888_v38, %v873_v37  ;;  %s1896_s17 = scalar_lea.sflag [#allocation18], %s3135_s6 }
  0xa7   : > { %767 = vadd.xlane.f32.xlu0 %v766_v1  ;;  %s3190_s4 = scalar_lea.vmem %s3454_s3, %s2198_s20  ;;  %s3456_s20 = sld [smem:[#allocation41_spill]] }
  0xa8   : > { %v1030_v27 = vld [vmem:[%s3190_s4] sm:$0xf]  ;;  %v1031_v29 = vld [vmem:[%s3190_s4 + $0x4] sm:$0xf]  ;;  %s2868_s3 = smov [#allocation17]  }
  0xa9   : > { %v1043_v28 = vsel %vm1038_vm2, %v1030_v27, 0  ;;  %v1089_v30 = vsel %vm1038_vm2, %v1031_v29, 0 }
  0xaa   : > { %2249 = vmatpush3.bf16.xpose.msra.mxu0 %v1089_v30 }
  0xab   : > { %2260 = vmatprep.subr.bf16.mxu0 %v2860_v8 }
 0x130   : > { %v768_v2 = vpop.xlane.xlu0 %767 }
 0x131   : > { %v770_v3 = vmul.f32 0.03125, %v768_v2 }
 0x133   : > { %v771_v4 = vsub.f32 %v762_v0, %v770_v3 }
 0x135   : > { %v772_v5 = vmul.f32 %v771_v4, %v771_v4 }
 0x137   : > { %v773_v6 = vsel %vm765_vm0, %v772_v5, 0.0 }
 0x138   : > { %774 = vadd.xlane.f32.xlu0 %v773_v6 }
 0x1c1   : > { %v775_v10 = vpop.xlane.xlu0 %774 }
 0x1c2   : > { %v776_v11 = vmul.f32 0.03125, %v775_v10 }
 0x1c4   : > { %v777_v12 = vadd.f32 1e-05, %v776_v11 }
 0x1c6   : > { %2490 = vrsqrt.f32 %v777_v12 }
 0x1d3   : > { %v2491_v13 = vpop.eup %2490 }
 0x1d4   : > { %v779_v15 = vmul.f32 %v2491_v13, %v771_v4 }
 0x1d6   : > { %v786_v17 = vmul.f32 %v2158_v14, %v779_v15 }
 0x1d8   : > { %v3179_v18 = vadd.f32 %v2159_v16, %v786_v17 }
 0x1da   : > { %v794_v19 = vpack.c.bf16 %v3179_v18, %v3179_v18 }
 0x1dc   : > { %2239 = vmatmul.mubr.msk.bf16.vlgmr.msra.gmra.mxu1 %vm765_vm0, %v794_v19 }
 0x1dd   : > { %2244 = vmatprep.mubr.msk.bf16.mxu1 %vm2861_vm1, %v2860_v8  ;;  %2243 = vmatpush3.bf16.xpose.msra.mxu1 %v1043_v28  ;;  %v1033_v28 = vld [vmem:[%s3190_s4 + $0xc] sm:$0xf] }
 0x1de   : > { %2254 = vmatprep.subr.bf16.mxu1 %v2860_v8  ;;  %v1181_v34 = vsel %vm1038_vm2, %v1033_v28, 0  ;;  %v1036_v28 = vld [vmem:[%s3139_s22 + $0x8] sm:$0xf] }
 0x29c   : > { %v855_v21 = vpop.f32.mrf.mxu1 }
 0x29d   : > { %v856_v22 = vadd.f32 %v2160_v20, %v855_v21 }
 0x29e   : > { %v2240_v23 = vpop.f32.mrf.mxu1 }
 0x29f   : > { %v861_v24 = vpack.c.bf16 %v856_v22, %v856_v22 }
 0x2a0   : > { %v858_v25 = vpop.f32.mrf.mxu1 }
 0x2a1   : > { %867 = vrot.lane.b32.xlu0 %v861_v24, %s2862_s2  ;;  %863 = vrot.lane.b32.xlu1 %v861_v24, %s2863_s18  ;;  %v875_v50 = vrot.slane %v861_v24, %v874_v39  ;;  %s1922_s2 = scalar_lea.hbm %s3456_s20, %s2193_s12  ;;  %s1924_s18 = sshll.u32 %s3259_s8, 4  ;;  %s1925_s18 = int_to_ptr.vmem [resolvable:$true] %s1924_s18 }
 0x2a2   : > { %v2241_v26 = vpop.f32.mrf.mxu1  ;;  %s2722_s23 = scalar_lea.vmem %s1925_s18, 128 }
 0x2a3   : > { %v1032_v26 = vld [vmem:[%s3190_s4 + $0x8] sm:$0xf]  ;;  %p2723_p1 = scmp.ne.s32.totalorder %s1925_s18, %s2722_s23  ;;  %s2726_s4 = sshll.u32 %s2868_s3, 4  ;;  %s2727_s4 = int_to_ptr.vmem [resolvable:$false] %s2726_s4 }
 0x2a4   : > { %v1135_v30 = vsel %vm1038_vm2, %v1032_v26, 0  ;;  %p2729_p3 = scmp.lt.s32.totalorder %s1925_s18, %s2727_s4 }
 0x2a5   : > { %865 = vrot.lane.b32.xlu1 %v861_v24, %s2864_s5  ;;  %p2724_p13 = pnand %p2723_p1, %p3102_p0  ;;  %s2728_s5 = scalar_lea.vmem %s2727_s4, 256 }
 0x2a6   : > { %p2730_p7 = scmp.lt.s32.totalorder %s2728_s5, %s2722_s23 }
 0x2a7   : > { %p2725_p2 = pneg %p2724_p13 }
 0x2a8   : > { %p2731_p4 = por %p2730_p7, %p2729_p3 }
 0x2aa   : > { %p2732_p5 = pnand %p2731_p4, %p2725_p2 }
 0x313   : > { %v868_v40 = vpop.permute.xlu0 %867  ;;  %v864_v41 = vpop.permute.xlu1 %863 }
 0x314   : > { %v917_v42 = vrot.slane %v868_v40, %v874_v39  ;;  %v909_v44 = vrot.slane %v864_v41, %v874_v39 }
 0x316   : > { %v918_v45 = vcombine.low %v909_v44, %v917_v42  ;;  %v919_v46 = vcombine.high %v909_v44, %v917_v42 }
 0x317   : > { %v866_v47 = vpop.permute.xlu1 %865 }
 0x318   : > { %v926_v48 = vrot.slane %v918_v45, %v891_v43  ;;  %v883_v49 = vrot.slane %v866_v47, %v874_v39  ;;  %v933_v51 = vrot.slane %v919_v46, %v891_v43 }
 0x31a   : > { %v884_v52 = vcombine.low %v875_v50, %v883_v49  ;;  %v885_v53 = vcombine.high %v875_v50, %v883_v49  ;;  %v934_v55 = vcombine.high %v926_v48, %v2867_v54  ;;  %v935_v58 = vcombine.high %v933_v51, %v2867_v54 }
 0x31b   : > { %v941_v59 = vshrl.u32 %v926_v48, 16  ;;  %v957_v1 = vshrl.u32 %v933_v51, 16 }
 0x31c   : > { %v892_v56 = vrot.slane %v884_v52, %v891_v43  ;;  %v899_v57 = vrot.slane %v885_v53, %v891_v43  ;;  %v949_v0 = vshrl.u32 %v934_v55, 16  ;;  %v965_v9 = vshrl.u32 %v935_v58, 16 }
 0x31e   : > { %v900_v60 = vcombine.high %v892_v56, %v2867_v54  ;;  %v901_v61 = vcombine.high %v899_v57, %v2867_v54  ;;  %v938_v62 = vpack.i.b16 %v926_v48, %v892_v56  ;;  %v940_v63 = vshrl.u32 %v892_v56, 16 }
 0x31f   : > { %v954_v2 = vpack.i.b16 %v933_v51, %v899_v57  ;;  %v956_v3 = vshrl.u32 %v899_v57, 16 }
 0x320   : > { %v942_v4 = vpack.i.b16 %v941_v59, %v940_v63  ;;  %v946_v5 = vpack.i.b16 %v934_v55, %v900_v60  ;;  %v948_v6 = vshrl.u32 %v900_v60, 16  ;;  %v962_v7 = vpack.i.b16 %v935_v58, %v901_v61 }
 0x321   : > { %v958_v10 = vpack.i.b16 %v957_v1, %v956_v3  ;;  %v964_v11 = vshrl.u32 %v901_v61, 16  ;;  %v968_v12 = vcombine.low %v938_v62, %v954_v2 }
 0x322   : > { %v950_v13 = vpack.i.b16 %v949_v0, %v948_v6  ;;  %v976_v14 = vcombine.low %v946_v5, %v962_v7 }
 0x323   : > { %v966_v15 = vpack.i.b16 %v965_v9, %v964_v11  ;;  %v993_v16 = vcombine.low %v942_v4, %v958_v10  ;;  %v975_v17 = vrot.slane %v968_v12, %v874_v39 }
 0x324   : > { %v983_v19 = vrot.slane %v976_v14, %v874_v39 }
 0x325   : > { %v1001_v20 = vcombine.low %v950_v13, %v966_v15  ;;  %v1000_v22 = vrot.slane %v993_v16, %v874_v39 }
 0x326   : > { %v984_v21 = vcombine.low %v975_v17, %v983_v19  ;;  %v1034_v19 = vld [vmem:[%s3139_s22] sm:$0xf] }
 0x327   : > { %v1008_v23 = vrot.slane %v1001_v20, %v874_v39  ;;  %v1035_v20 = vld [vmem:[%s3139_s22 + $0x4] sm:$0xf] }
 0x328   : > { %v991_v25 = vrot.slane %v984_v21, %v891_v43  ;;  %v1290_v21 = vsel %vm1288_vm3, %v1034_v19, 0 }
 0x329   : > { %v1009_v24 = vcombine.low %v1000_v22, %v1008_v23  ;;  %v1336_v22 = vsel %vm1288_vm3, %v1035_v20, 0 }
 0x32a   : > { %v1021_v31 = vshrl.u32 %v991_v25, 16  ;;  %v992_v36 = vcombine.high %v991_v25, %v2867_v54 }
 0x32b   : > { %v1016_v27 = vrot.slane %v1009_v24, %v891_v43 }
 0x32c   : > { %v1027_v39 = vshrl.u32 %v992_v36, 16 }
 0x32d   : > { %v1020_v29 = vpack.i.b16 %v1016_v27, %v991_v25  ;;  %v1022_v32 = vshrl.u32 %v1016_v27, 16  ;;  %v1017_v35 = vcombine.high %v1016_v27, %v2867_v54 }
 0x32f   : > { %2245 = vmatmul.mubr.msk.bf16.vlgmr.msra.gmra.mxu1 %vm1038_vm2, %v1020_v29  ;;  %v1023_v33 = vpack.i.b16 %v1022_v32, %v1021_v31  ;;  %v1028_v37 = vshrl.u32 %v1017_v35, 16  ;;  %v1026_v38 = vpack.i.b16 %v1017_v35, %v992_v36  ;;  %v1382_v31 = vsel %vm1288_vm3, %v1036_v28, 0 }
 0x330   : > { %2255 = vmatpush3.bf16.xpose.msra.mxu1 %v1135_v30  ;;  %2256 = vmatprep.mubr.msk.bf16.mxu1 %vm2861_vm1, %v2860_v8 }
 0x331   : > { %2251 = vmatmul.mubr.msk.bf16.vlgmr.msra.gmra.mxu0 %vm1038_vm2, %v1023_v33  ;;  %2266 = vmatprep.subr.bf16.mxu1 %v2860_v8  ;;  %v1029_v40 = vpack.i.b16 %v1028_v37, %v1027_v39  ;;  %v1037_v33 = vld [vmem:[%s3139_s22 + $0xc] sm:$0xf] }
 0x332   : > { %2261 = vmatpush3.bf16.xpose.msra.mxu0 %v1181_v34  ;;  %2262 = vmatprep.mubr.msk.bf16.mxu0 %vm2861_vm1, %v2860_v8  ;;  %v1428_v36 = vsel %vm1288_vm3, %v1037_v33, 0 }
 0x333   : > { %2272 = vmatprep.subr.bf16.mxu0 %v2860_v8 }
 0x337   : > { %2257 = vmatmul.mubr.msk.bf16.vlgmr.msra.gmra.mxu1 %vm1038_vm2, %v1026_v38  ;;  %v1474_v38 = vld [vmem:[#allocation8] sm:$0xf] }
 0x338   : > { %2268 = vmatprep.mubr.msk.bf16.mxu1 %vm2861_vm1, %v2860_v8  ;;  %2267 = vmatpush3.bf16.msra.mxu1 %v1290_v21 }
 0x339   : > { %2263 = vmatmul.mubr.msk.bf16.vlgmr.msra.gmra.mxu0 %vm1038_vm2, %v1029_v40  ;;  %2278 = vmatprep.subr.bf16.mxu1 %v2860_v8 }
 0x33a   : > { %2274 = vmatprep.mubr.msk.bf16.mxu0 %vm2861_vm1, %v2860_v8  ;;  %2273 = vmatpush3.bf16.msra.mxu0 %v1336_v22 }
 0x33b   : > { %2284 = vmatprep.subr.bf16.mxu0 %v2860_v8 }
 0x3ef   : > { %v1079_v41 = vpop.f32.mrf.mxu1 }
 0x3f0   : > { %v1223_v42 = vsel %vm1038_vm2, %v1079_v41, -inf }
 0x3f1   : > { %v1125_v43 = vpop.f32.mrf.mxu0  ;;  %1224 = vmax.xlane.f32.xlu1 %v1223_v42  ;;  %v2246_v44 = vpop.f32.mrf.mxu1 }
 0x3f2   : > { %v1226_v45 = vsel %vm1038_vm2, %v1125_v43, -inf  ;;  %v1482_v44 = vsel %vm1288_vm3, %v1474_v38, 0 }
 0x3f3   : > { %1227 = vmax.xlane.f32.xlu0 %v1226_v45  ;;  %v1082_v46 = vpop.f32.mrf.mxu1  ;;  %v2252_v47 = vpop.f32.mrf.mxu0 }
 0x3f4   : > { %v1475_v47 = vld [vmem:[#allocation8 + $0x4] sm:$0xf] }
 0x3f5   : > { %v2247_v48 = vpop.f32.mrf.mxu1  ;;  %v1128_v49 = vpop.f32.mrf.mxu0 }
 0x3f7   : > { %v2253_v50 = vpop.f32.mrf.mxu0  ;;  %v1171_v51 = vpop.f32.mrf.mxu1 }
 0x3f8   : > { %v1229_v52 = vsel %vm1038_vm2, %v1171_v51, -inf }
 0x3f9   : > { %v1217_v53 = vpop.f32.mrf.mxu0  ;;  %1230 = vmax.xlane.f32.xlu1 %v1229_v52  ;;  %v2258_v54 = vpop.f32.mrf.mxu1 }
 0x3fa   : > { %v1232_v57 = vsel %vm1038_vm2, %v1217_v53, -inf }
 0x3fb   : > { %v1174_v55 = vpop.f32.mrf.mxu1  ;;  %v2264_v56 = vpop.f32.mrf.mxu0 }
 0x3fc   : > { %v1476_v55 = vld [vmem:[#allocation8 + $0x8] sm:$0xf] }
 0x3fd   : > { %v1220_v58 = vpop.f32.mrf.mxu0  ;;  %1233 = vmax.xlane.f32.xlu1 %v1232_v57  ;;  %v2259_v59 = vpop.f32.mrf.mxu1 }
 0x3fe   : > { %v1574_v58 = vsel %vm1288_vm3, %v1476_v55, 0 }
 0x3ff   : > { %v2265_v60 = vpop.f32.mrf.mxu0 }
 0x400   : > { %v1477_v60 = vld [vmem:[#allocation8 + $0xc] sm:$0xf] }
 0x47a   : > { %v1225_v61 = vpop.xlane.xlu1 %1224 }
 0x47b   : > { %v1235_v62 = vsub.f32 %v1079_v41, %v1225_v61 }
 0x47c   : > { %v1228_v63 = vpop.xlane.xlu0 %1227 }
 0x47d   : > { %v1239_v0 = vmul.f32 1.442695, %v1235_v62  ;;  %v1236_v1 = vsub.f32 %v1125_v43, %v1228_v63 }
 0x47f   : > { %2492 = vpow2.f32 %v1239_v0  ;;  %v1241_v2 = vmul.f32 1.442695, %v1236_v1  ;;  %v1620_v0 = vsel %vm1288_vm3, %v1477_v60, 0 }
 0x481   : > { %2494 = vpow2.f32 %v1241_v2 }
 0x482   : > { %v1231_v3 = vpop.xlane.xlu1 %1230 }
 0x483   : > { %v1237_v4 = vsub.f32 %v1171_v51, %v1231_v3  ;;  %v1528_v51 = vsel %vm1288_vm3, %v1475_v47, 0 }
 0x485   : > { %v1243_v5 = vmul.f32 1.442695, %v1237_v4 }
 0x486   : > { %v1234_v6 = vpop.xlane.xlu1 %1233 }
 0x487   : > { %2496 = vpow2.f32 %v1243_v5  ;;  %v1238_v7 = vsub.f32 %v1217_v53, %v1234_v6 }
 0x489   : > { %v1245_v9 = vmul.f32 1.442695, %v1238_v7 }
 0x48b   : > { %2498 = vpow2.f32 %v1245_v9 }
 0x48c   : > { %v2493_v10 = vpop.eup %2492 }
 0x48d   : > { %v1247_v11 = vsel %vm1038_vm2, %v2493_v10, 0.0 }
 0x48e   : > { %v2495_v12 = vpop.eup %2494  ;;  %1248 = vadd.xlane.f32.xlu1 %v1247_v11 }
 0x48f   : > { %v1250_v13 = vsel %vm1038_vm2, %v2495_v12, 0.0 }
 0x492   : > { %1251 = vadd.xlane.f32.xlu1 %v1250_v13 }
 0x494   : > { %v2497_v14 = vpop.eup %2496 }
 0x495   : > { %v1253_v15 = vsel %vm1038_vm2, %v2497_v14, 0.0 }
 0x496   : > { %1254 = vadd.xlane.f32.xlu1 %v1253_v15 }
 0x498   : > { %v2499_v16 = vpop.eup %2498 }
 0x499   : > { %v1256_v17 = vsel %vm1038_vm2, %v2499_v16, 0.0 }
 0x49a   : > { %1257 = vadd.xlane.f32.xlu0 %v1256_v17 }
 0x517   : > { %v1249_v23 = vpop.xlane.xlu1 %1248 }
 0x518   : > { %2500 = vrcp.f32 %v1249_v23 }
 0x51b   : > { %v1252_v24 = vpop.xlane.xlu1 %1251 }
 0x51c   : > { %2502 = vrcp.f32 %v1252_v24 }
 0x51f   : > { %v1255_v25 = vpop.xlane.xlu1 %1254 }
 0x520   : > { %2504 = vrcp.f32 %v1255_v25 }
 0x523   : > { %v1258_v26 = vpop.xlane.xlu0 %1257 }
 0x524   : > { %2506 = vrcp.f32 %v1258_v26 }
 0x525   : > { %v2501_v27 = vpop.eup %2500 }
 0x526   : > { %v1267_v29 = vmul.f32 %v2501_v27, %v2493_v10 }
 0x528   : > { %v1281_v30 = vpack.c.bf16 %v1267_v29, %v1267_v29  ;;  %v1271_v41 = vsel %vm1038_vm2, %v1267_v29, 0.0 }
 0x529   : > { %v2503_v32 = vpop.eup %2502 }
 0x52a   : > { %2269 = vmatmul.mubr.msk.bf16.vlgmr.msra.gmra.mxu1 %vm1038_vm2, %v1281_v30  ;;  %v1268_v34 = vmul.f32 %v2503_v32, %v2495_v12 }
 0x52b   : > { %2279 = vmatpush3.bf16.msra.mxu1 %v1382_v31  ;;  %2280 = vmatprep.mubr.msk.bf16.mxu1 %vm2861_vm1, %v2860_v8 }
 0x52c   : > { %v1282_v35 = vpack.c.bf16 %v1268_v34, %v1268_v34  ;;  %2290 = vmatprep.subr.bf16.mxu1 %v2860_v8  ;;  %v1272_v39 = vsel %vm1038_vm2, %v1268_v34, 0.0 }
 0x52d   : > { %v2505_v37 = vpop.eup %2504  ;;  %v1273_v46 = vadd.f32 %v1272_v39, %v1271_v41 }
 0x52e   : > { %2275 = vmatmul.mubr.msk.bf16.vlgmr.msra.gmra.mxu0 %vm1038_vm2, %v1282_v35  ;;  %v1269_v40 = vmul.f32 %v2505_v37, %v2497_v14  ;;  %v2176_v35 = vld [vmem:[#allocation10] ss:$0 sm:$0xff] }
 0x52f   : > { %2285 = vmatpush3.bf16.msra.mxu0 %v1428_v36  ;;  %2286 = vmatprep.mubr.msk.bf16.mxu0 %vm2861_vm1, %v2860_v8 }
 0x530   : > { %v1274_v42 = vsel %vm1038_vm2, %v1269_v40, 0.0  ;;  %v1283_v43 = vpack.c.bf16 %v1269_v40, %v1269_v40  ;;  %2296 = vmatprep.subr.bf16.mxu0 %v2860_v8 }
 0x531   : > { %v2507_v45 = vpop.eup %2506  ;;  %v1275_v49 = vadd.f32 %v1274_v42, %v1273_v46 }
 0x532   : > { %2281 = vmatmul.mubr.msk.bf16.vlgmr.msra.gmra.mxu1 %vm1038_vm2, %v1283_v43  ;;  %v1270_v48 = vmul.f32 %v2507_v45, %v2499_v16 }
 0x533   : > { %2291 = vmatpush3.bf16.msra.mxu1 %v1482_v44  ;;  %2292 = vmatprep.mubr.msk.bf16.mxu1 %vm2861_vm1, %v2860_v8 }
 0x534   : > { %v1284_v50 = vpack.c.bf16 %v1270_v48, %v1270_v48  ;;  %2302 = vmatprep.subr.bf16.mxu1 %v2860_v8  ;;  %v1276_v52 = vsel %vm1038_vm2, %v1270_v48, 0.0 }
 0x535   : > { %v1277_v53 = vadd.f32 %v1276_v52, %v1275_v49  ;;  %v2484_v49 = vld [vmem:[%s3403_s13 + $0x8] sm:$0xff]  }
 0x536   : > { %2287 = vmatmul.mubr.msk.bf16.vlgmr.msra.gmra.mxu0 %vm1038_vm2, %v1284_v50  ;;  %v2485_v50 = vld [vmem:[%s3403_s13] sm:$0xff]  }
 0x537   : > { %2297 = vmatpush3.bf16.msra.mxu0 %v1528_v51  ;;  %2298 = vmatprep.mubr.msk.bf16.mxu0 %vm2861_vm1, %v2860_v8  ;;  %v1279_v54 = vmul.f32 0.25, %v1277_v53  ;;  %v2487_v51 = vld [vmem:[%s3405_s15 + $0x10] sm:$0xff]  }
 0x538   : > { %2308 = vmatprep.subr.bf16.mxu0 %v2860_v8 }
 0x539   : > { %1280 = vst.msk [vmem:[%s3259_s8] sm:$0xff] %vm1038_vm2, %v1279_v54 }
 0x5ea   : > { %v1326_v56 = vpop.f32.mrf.mxu1 }
 0x5eb   : > { %v1470_v57 = vpack.c.bf16 %v1326_v56, %v1326_v56  ;;  %v2177_v56 = vld [vmem:[#allocation14] ss:$0 sm:$0xff] }
 0x5ec   : > { %v2270_v59 = vpop.f32.mrf.mxu1 }
 0x5ed   : > { %2293 = vmatmul.mubr.msk.bf16.vlgmr.msra.gmra.mxu1 %vm1038_vm2, %v1470_v57 }
 0x5ee   : > { %v1329_v61 = vpop.f32.mrf.mxu1  ;;  %v1372_v62 = vpop.f32.mrf.mxu0  ;;  %2303 = vmatpush3.bf16.msra.mxu1 %v1574_v58  ;;  %2304 = vmatprep.mubr.msk.bf16.mxu1 %vm2861_vm1, %v2860_v8  ;;  %v2178_v58 = vld [vmem:[%s3400_s10] ss:$0 sm:$0xff] }
 0x5ef   : > { %v1471_v63 = vpack.c.bf16 %v1372_v62, %v1372_v62  ;;  %2314 = vmatprep.subr.bf16.mxu1 %v2860_v8  ;;  %v2488_v62 = vld [vmem:[%s3405_s15 + $0x8] sm:$0xff]  }
 0x5f0   : > { %v2271_v1 = vpop.f32.mrf.mxu1  ;;  %v2276_v2 = vpop.f32.mrf.mxu0 }
 0x5f1   : > { %2299 = vmatmul.mubr.msk.bf16.vlgmr.msra.gmra.mxu0 %vm1038_vm2, %v1471_v63  ;;  %v2489_v63 = vld [vmem:[%s3405_s15] sm:$0xff]  }
 0x5f2   : > { %2309 = vmatpush3.bf16.msra.mxu0 %v1620_v0  ;;  %v1375_v3 = vpop.f32.mrf.mxu0  ;;  %v1418_v4 = vpop.f32.mrf.mxu1  ;;  %2310 = vmatprep.mubr.msk.bf16.mxu0 %vm2861_vm1, %v2860_v8  ;;  %v2179_v0 = vld [vmem:[%s3404_s14] ss:$0 sm:$0xff] }
 0x5f3   : > { %v1472_v5 = vpack.c.bf16 %v1418_v4, %v1418_v4  ;;  %2322 = vmatprep.subr.bf16.mxu0 %v2860_v8 }
 0x5f4   : > { %v2277_v6 = vpop.f32.mrf.mxu0  ;;  %v2282_v7 = vpop.f32.mrf.mxu1 }
 0x5f5   : > { %2305 = vmatmul.mubr.msk.bf16.vlgmr.msra.gmra.mxu1 %vm1038_vm2, %v1472_v5 }
 0x5f6   : > { %v1421_v9 = vpop.f32.mrf.mxu1  ;;  %v1464_v10 = vpop.f32.mrf.mxu0  ;;  %2318 = vmatprep.mubr.msk.bf16.mxu1 %vm2861_vm1, %v2860_v8  ;;  %2315 = vmatpush3.bf16.msra.mxu1 %v2484_v49 }
 0x5f7   : > { %v1473_v11 = vpack.c.bf16 %v1464_v10, %v1464_v10  ;;  %2316 = vmatprep.subr.bf16.mxu1 %v2860_v8 }
 0x5f8   : > { %v2283_v12 = vpop.f32.mrf.mxu1  ;;  %v2288_v13 = vpop.f32.mrf.mxu0 }
 0x5f9   : > { %2311 = vmatmul.mubr.msk.bf16.vlgmr.msra.gmra.mxu0 %vm1038_vm2, %v1473_v11 }
 0x5fa   : > { %v1467_v14 = vpop.f32.mrf.mxu0  ;;  %2330 = vmatprep.mubr.msk.bf16.mxu0 %vm2861_vm1, %v2860_v8  ;;  %2317 = vmatpush3.bf16.msra.mxu1 %v2485_v50 }
 0x5fc   : > { %v2289_v15 = vpop.f32.mrf.mxu0 }
 0x6ad   : > { %v1518_v16 = vpop.f32.mrf.mxu1 }
 0x6ae   : > { %v1662_v26 = vsel %vm765_vm0, %v1518_v16, 0.0 }
 0x6af   : > { %v2294_v17 = vpop.f32.mrf.mxu1 }
 0x6b1   : > { %v1521_v19 = vpop.f32.mrf.mxu1  ;;  %v1564_v20 = vpop.f32.mrf.mxu0 }
 0x6b2   : > { %v1663_v23 = vsel %vm765_vm0, %v1564_v20, 0.0 }
 0x6b3   : > { %v2295_v21 = vpop.f32.mrf.mxu1  ;;  %v2300_v22 = vpop.f32.mrf.mxu0  ;;  %v1664_v28 = vadd.f32 %v1663_v23, %v1662_v26 }
 0x6b5   : > { %v1567_v24 = vpop.f32.mrf.mxu0  ;;  %v1610_v25 = vpop.f32.mrf.mxu1 }
 0x6b6   : > { %v1665_v27 = vsel %vm765_vm0, %v1610_v25, 0.0 }
 0x6b7   : > { %v2301_v29 = vpop.f32.mrf.mxu0  ;;  %v2306_v30 = vpop.f32.mrf.mxu1  ;;  %v1666_v31 = vadd.f32 %v1665_v27, %v1664_v28 }
 0x6b9   : > { %v1613_v32 = vpop.f32.mrf.mxu1  ;;  %v1656_v33 = vpop.f32.mrf.mxu0 }
 0x6ba   : > { %v1667_v34 = vsel %vm765_vm0, %v1656_v33, 0.0 }
 0x6bb   : > { %v1668_v36 = vadd.f32 %v1667_v34, %v1666_v31  ;;  %v2307_v37 = vpop.f32.mrf.mxu1  ;;  %v2312_v38 = vpop.f32.mrf.mxu0 }
 0x6bd   : > { %v1676_v39 = vadd.f32 %v2176_v35, %v1668_v36  ;;  %v1659_v40 = vpop.f32.mrf.mxu0 }
 0x6bf   : > { %v2313_v41 = vpop.f32.mrf.mxu0  ;;  %v1677_v42 = vadd.f32 %v1676_v39, %v3179_v18  ;;  %v2486_v18 = vld [vmem:[%s3405_s15 + $0x18] sm:$0xff]  }
 0x6c0   : > { %2323 = vmatpush3.bf16.msra.mxu0 %v2486_v18 }
 0x6c1   : > { %v1680_v43 = vsel %vm765_vm0, %v1677_v42, 0.0  ;;  %2324 = vmatprep.subr.bf16.mxu0 %v2860_v8 }
 0x6c2   : > { %1681 = vadd.xlane.f32.xlu1 %v1680_v43 }
 0x6c4   : > { %2325 = vmatpush3.bf16.msra.mxu0 %v2487_v51 }
 0x6c5   : > { %2326 = vmatprep.subr.bf16.mxu0 %v2860_v8 }
 0x6c8   : > { %2327 = vmatpush3.bf16.msra.mxu0 %v2488_v62 }
 0x6c9   : > { %2328 = vmatprep.subr.bf16.mxu0 %v2860_v8  ;;  %v2183_v8 = vld [vmem:[%s3455_s1] ss:$0 sm:$0xff] }
 0x6cc   : > { %2329 = vmatpush3.bf16.msra.mxu0 %v2489_v63 }
 0x74b   : > { %v1682_v44 = vpop.xlane.xlu1 %1681 }
 0x74c   : > { %v1683_v45 = vmul.f32 0.03125, %v1682_v44 }
 0x74e   : > { %v1684_v46 = vsub.f32 %v1677_v42, %v1683_v45 }
 0x750   : > { %v1685_v47 = vmul.f32 %v1684_v46, %v1684_v46 }
 0x752   : > { %v1686_v48 = vsel %vm765_vm0, %v1685_v47, 0.0 }
 0x753   : > { %1687 = vadd.xlane.f32.xlu0 %v1686_v48 }
 0x7dc   : > { %v1688_v52 = vpop.xlane.xlu0 %1687 }
 0x7dd   : > { %v1689_v53 = vmul.f32 0.03125, %v1688_v52 }
 0x7df   : > { %v1690_v54 = vadd.f32 1e-05, %v1689_v53 }
 0x7e1   : > { %2508 = vrsqrt.f32 %v1690_v54 }
 0x7ee   : > { %v2509_v55 = vpop.eup %2508 }
 0x7ef   : > { %v1692_v57 = vmul.f32 %v2509_v55, %v1684_v46 }
 0x7f1   : > { %v1699_v59 = vmul.f32 %v2177_v56, %v1692_v57 }
 0x7f3   : > { %v1706_v60 = vadd.f32 %v2178_v58, %v1699_v59 }
 0x7f5   : > { %v1707_v61 = vpack.c.bf16 %v1706_v60, %v1706_v60 }
 0x7f7   : > { %2319 = vmatmul.mubr.msk.bf16.vlgmr.msra.gmra.mxu1 %vm765_vm0, %v1707_v61 }
 0x8b7   : > { %v1768_v1 = vpop.f32.mrf.mxu1 }
 0x8b8   : > { %v1769_v2 = vadd.f32 %v2179_v0, %v1768_v1 }
 0x8b9   : > { %v2320_v3 = vpop.f32.mrf.mxu1 }
 0x8ba   : > { %v1774_v4 = vmax.f32 %v1769_v2, 0.0 }
 0x8bb   : > { %v1771_v5 = vpop.f32.mrf.mxu1 }
 0x8bc   : > { %v1775_v6 = vpack.c.bf16 %v1774_v4, %v1774_v4 }
 0x8bd   : > { %v2321_v7 = vpop.f32.mrf.mxu1 }
 0x8be   : > { %2331 = vmatmul.mubr.msk.bf16.vlgmr.msra.gmra.mxu0 %vm1815_vm4, %v1775_v6 }
 0x97e   : > { %v1853_v9 = vpop.f32.mrf.mxu0 }
 0x97f   : > { %v1854_v10 = vadd.f32 %v2183_v8, %v1853_v9 }
 0x980   : > { %v2332_v11 = vpop.f32.mrf.mxu0 }
 0x981   : > { %v1859_v12 = vadd.f32 %v1854_v10, %v1706_v60 }
 0x982   : > { %v1856_v13 = vpop.f32.mrf.mxu0 }
 0x983   : > { %v1862_v14 = vsel %vm765_vm0, %v1859_v12, 0.0 }
 0x984   : > { %1863 = vadd.xlane.f32.xlu1 %v1862_v14  ;;  %v2333_v15 = vpop.f32.mrf.mxu0 }
 0xa0d   : > { %v1864_v16 = vpop.xlane.xlu1 %1863 }
 0xa0e   : > { %v1865_v17 = vmul.f32 0.03125, %v1864_v16 }
 0xa10   : > { %v1866_v19 = vsub.f32 %v1859_v12, %v1865_v17 }
 0xa12   : > { %v1867_v20 = vmul.f32 %v1866_v19, %v1866_v19 }
 0xa14   : > { %v1868_v21 = vsel %vm765_vm0, %v1867_v20, 0.0 }
 0xa15   : > { %1869 = vadd.xlane.f32.xlu0 %v1868_v21 }
 0xa16   : > { %2735 = shalt.err (!%p2732_p5)
}
 0xa17   : > { %s2736_s22 = scalar_lea.hbm %s1922_s2, 128  ;;  %s2740_s21 = scalar_lea.hbm %s3456_s20, 256 }
 0xa18   : > { %p2737_p8 = scmp.ne.s32.totalorder %s1922_s2, %s2736_s22  ;;  %p2741_p12 = scmp.lt.s32.totalorder %s1922_s2, %s3456_s20 }
 0xa19   : > { %p2742_p9 = scmp.lt.s32.totalorder %s2740_s21, %s2736_s22 }
 0xa1a   : > { %p2738_p10 = pnand %p2737_p8, %p3102_p0 }
 0xa1b   : > { %p2743_p6 = por %p2742_p9, %p2741_p12 }
 0xa1c   : > { %p2739_p11 = pneg %p2738_p10 }
 0xa1e   : > { %p2744_p1 = pnand %p2743_p6, %p2739_p11 }
 0xa20   : > { %2747 = shalt.err (!%p2744_p1)
}
 0xa21   : > { %2365 = dma.vmem_to_hbm [thread:$0]  (%p3102_p0), %s1925_s18, 128, %s1922_s2, %s1896_s17  }
 0xa22   : > { %s3457_s3 = sld [smem:[#allocation37_spill]]  ;;  %s741_s8 = scalar_lea.vmem [#allocation16], %s2153_s9 }
 0xa23   : > { %s3458_s22 = sld [smem:[#allocation38_spill]]  ;;  %s1910_s7 = sshll.u32 %s741_s8, 4  ;;  %s1911_s7 = int_to_ptr.vmem [resolvable:$true] %s1910_s7 }
 0xa24   : > { %s3459_s17 = sld [smem:[#allocation40_spill]]  ;;  %s1891_s1 = scalar_lea.sflag [#allocation4], %s3135_s6 }
 0xa25   : > { %s2748_s25 = scalar_lea.vmem %s1911_s7, 128  ;;  %s2869_s11 = smov [#allocation16]  }
 0xa26   : > { %p2749_p13 = scmp.ne.s32.totalorder %s1911_s7, %s2748_s25  ;;  %s2752_s23 = sshll.u32 %s2869_s11, 4  ;;  %s2753_s23 = int_to_ptr.vmem [resolvable:$false] %s2752_s23 }
 0xa27   : > { %s2754_s9 = scalar_lea.vmem %s2753_s23, 256  ;;  %p2755_p7 = scmp.lt.s32.totalorder %s1911_s7, %s2753_s23 }
 0xa28   : > { %v2189_v26 = vld [vmem:[%s3457_s3] ss:$0 sm:$0xff]  ;;  %p2750_p2 = pnand %p2749_p13, %p3102_p0  ;;  %p2756_p4 = scmp.lt.s32.totalorder %s2754_s9, %s2748_s25 }
 0xa29   : > { %v2190_v28 = vld [vmem:[%s3458_s22] ss:$0 sm:$0xff] }
 0xa2a   : > { %s1908_s21 = scalar_lea.hbm %s3459_s17, %s2193_s12  ;;  %p2751_p3 = pneg %p2750_p2 }
 0xa2b   : > { %p2757_p5 = por %p2756_p4, %p2755_p7 }
 0xa2d   : > { %p2758_p8 = pnand %p2757_p5, %p2751_p3 }
 0xa9e   : > { %v1870_v22 = vpop.xlane.xlu0 %1869 }
 0xa9f   : > { %v1871_v23 = vmul.f32 0.03125, %v1870_v22 }
 0xaa1   : > { %v1872_v24 = vadd.f32 1e-05, %v1871_v23 }
 0xaa3   : > { %2510 = vrsqrt.f32 %v1872_v24 }
 0xab0   : > { %v2511_v25 = vpop.eup %2510 }
 0xab1   : > { %v1874_v27 = vmul.f32 %v2511_v25, %v1866_v19 }
 0xab3   : > { %v1881_v29 = vmul.f32 %v2189_v26, %v1874_v27 }
 0xab5   : > { %v1888_v30 = vadd.f32 %v2190_v28, %v1881_v29 }
 0xab7   : > { %1889 = vst.msk [vmem:[%s741_s8] sm:$0xff] %vm765_vm0, %v1888_v30 }
 0xab8   : > { %2761 = shalt.err (!%p2758_p8)
}
 0xab9   : > { %s2762_s30 = scalar_lea.hbm %s1908_s21, 128  ;;  %s2766_s3 = scalar_lea.hbm %s3459_s17, 256 }
 0xaba   : > { %p2763_p10 = scmp.ne.s32.totalorder %s1908_s21, %s2762_s30  ;;  %p2767_p9 = scmp.lt.s32.totalorder %s1908_s21, %s3459_s17 }
 0xabb   : > { %p2768_p6 = scmp.lt.s32.totalorder %s2766_s3, %s2762_s30 }
 0xabc   : > { %p2764_p11 = pnand %p2763_p10, %p3102_p0 }
 0xabd   : > { %p2769_p1 = por %p2768_p6, %p2767_p9 }
 0xabe   : > { %p2765_p12 = pneg %p2764_p11 }
 0xac0   : > { %p2770_p13 = pnand %p2769_p1, %p2765_p12 }
 0xac2   : > { %2773 = shalt.err (!%p2770_p13)
}
 0xac3   : > { %2364 = dma.vmem_to_hbm [thread:$0]  (%p3102_p0), %s1911_s7, 128, %s1908_s21, %s1891_s1  }
 0xac4 PF: > { %s1936_s22 = sand.u32 1, %s2828_s27   ;;  %p3460_p2 = scmp.ne.s32.totalorder %s3447_s16, 0 }
 0xac5   : > { %p3461_p3 = scmp.ge.s32.totalorder %s2848_s19, 2  ;;  %s1937_s8 = scalar_lea.sflag [#allocation4], %s1936_s22 }
 0xac7   : > { %p2395_p7 = pnand %p3461_p3, %p3460_p2 }
 0xac9   : > { %p2396_p4 = pneg %p2395_p7 }
 0xacb   : > { %2819 = dma.done.wait (%p2396_p4), %s1937_s8, 128  }
 0xacc   : > { %2821 = vsyncadd (%p2396_p4), %s1937_s8, 4294967168  ;;  %s1946_s2 = scalar_lea.sflag [#allocation18], %s1936_s22 }
 0xacd   : > { %2823 = dma.done.wait (%p2396_p4), %s1946_s2, 128  }
 0xace   : > { %2825 = vsyncadd (%p2396_p4), %s1946_s2, 4294967168  ;;  %s42_s19 = sadd.s32 1, %s2848_s19   ;;  %s3462_s24 = sld [smem:[#allocation26_spill]] }
 0xacf   : > { %p39_p5 = scmp.ge.s32.totalorder %s42_s19, 4   ;;  %s3463_s27 = smov %s2832_s28 }
 0xad0   : > { %s3464_s28 = smov %s2836_s29  ;;  %s3465_s29 = smov %s3108_s26 }
 0xad1   : > { %s3466_s30 = smov %s2844_s0  ;;  %41 = sbr.rel (!%p39_p5) target bundleno = 28 (0x1c), region = 184 }
 0xad4   : > { %s3467_s0 = smov %s3462_s24 }
 0xad6   :  { %1951 = vsyncpa [#allocation3], 1 }
 0xad7   :  { %1953 = vsyncpa [#allocation3 + $0x1], 1 }
 0xad8   :  { %1954 = vsyncpa [#allocation6], 1 }
 0xad9   :  { %1955 = vsyncpa [#allocation9], 1 }
 0xada   :  { %1956 = vsyncpa [#allocation12], 1 }
 0xadb   :  { %1957 = vsyncpa [#allocation15], 1 }
 0xadc   :  { %1958 = vsyncpa [#allocation4], 1 }
 0xadd   :  { %1960 = vsyncpa [#allocation4 + $0x1], 1 }
 0xade   :  { %1961 = vsyncpa [#allocation18], 1 }
 0xadf   :  { %1963 = vsyncpa [#allocation18 + $0x1], 1 }

</bundles_post_ra>
